<compile_context>
chip_gen: v6e
topology: v6e:2x2x1
jax: 0.10.0
libtpu: 0.0.40
codegen_flags: <defaults>
</compile_context>

<pallas_src>
import jax
import jax.numpy as jnp
import numpy as np
from jax import lax
from jax.experimental import pallas as pl
from jax.experimental.pallas import tpu as pltpu

K = 3                     # kernel_size
DILATIONS = (1, 3, 5)     # convs1 dilations; convs2 all use dilation 1
RECEPTIVE_RADIUS = sum(d + 1 for d in DILATIONS)   # = 12
HALO = 128                # halo per side, multiple of 128 for lane alignment
assert HALO >= RECEPTIVE_RADIUS and HALO % 128 == 0, (
    "HALO must cover the block's receptive radius and stay lane-aligned")


def _vmem_capacity_bytes():
  """Per-core VMEM capacity (bytes); conservative 64 MiB fallback."""
  try:
    info = pltpu.get_tpu_info()
  except Exception:
    return 64 * 1024 * 1024
  for name in ("vmem_capacity_bytes", "vmem_size_bytes", "vmem_bytes"):
    v = getattr(info, name, None)
    if v:
      return int(v)
  return 64 * 1024 * 1024


def _estimate_step_vmem_bytes(C, t_tile, out_itemsize):
  """Rough live-VMEM model for one grid step (used only for tile selection)."""
  W = t_tile + 2 * HALO
  KC = K * C
  return (2 * C * W * 2                       # double-buffered bf16 windows
          + 5 * C * W * 4                     # live f32 temporaries (trunk/act/conv)
          + 3 * C * W * 2                     # bf16 shifted taps / fused operand
          + 2 * C * t_tile * out_itemsize     # double-buffered output tile
          + 2 * (2 * C * KC * 2 + 2 * C * 4))  # double-buffered weights + biases


def _pick_t_tile(C, T, out_itemsize):
  """Largest 128-multiple time tile that fits the generation's VMEM budget."""
  budget = int(0.7 * _vmem_capacity_bytes())        # leave compiler headroom
  cap_by_T = max(128, ((T + 127) // 128) * 128)     # don't over-pad short T
  best = 128
  for cand in (256, 512, 1024, 2048):
    if cand > cap_by_T:
      break
    if _estimate_step_vmem_bytes(C, cand, out_itemsize) <= budget:
      best = cand
  # TODO(synk): on v7x also check that B * cdiv(T, t_tile) keeps both
  # TensorCores busy; shrink the tile if the parallel grid would idle a core.
  return min(best, cap_by_T)


def _pallas_resblock1(xpad, w1f, b1, w2f, b2, *, C, T, T_pad, t_tile, out_dtype):
  """Pallas call on the zero-padded bf16 input xpad: (B, C, HALO+T_pad+HALO)."""
  B = xpad.shape[0]
  NT = T_pad // t_tile
  W = t_tile + 2 * HALO            # haloed window width per grid step
  KC = K * C
  fuse_taps = C < 128              # small C: fused 3C contraction fills the MXU

  def kernel(x_hbm, w1_ref, b1_ref, w2_ref, b2_ref, o_ref, xwin, dma_sem):
    b = pl.program_id(0)
    j = pl.program_id(1)
    nt = pl.num_programs(1)
    slot = j & 1

    def start_fetch(jj, s):
      t0 = pl.multiple_of(jj * t_tile, 128)      # window start (padded coords)
      pltpu.make_async_copy(x_hbm.at[b, :, pl.ds(t0, W)],
                            xwin.at[s], dma_sem.at[s]).start()

    # Prime the pipeline at the first time tile of every batch row.
    @pl.when(j == 0)
    def _():
      start_fetch(0, slot)

    # Prefetch the next window of the same batch row into the other slot
    # (the j axis is "arbitrary" -> sequential per core, so this is safe).
    @pl.when(j + 1 < nt)
    def _():
      start_fetch(j + 1, 1 - slot)

    # Wait for the current haloed window and upcast once to f32.
    pltpu.make_async_copy(x_hbm.at[b, :, pl.ds(0, W)],
                          xwin.at[slot], dma_sem.at[slot]).wait()
    x0 = xwin[slot].astype(jnp.float32)

    # Weights/biases are constant across the grid: load once into values.
    w1s = [w1_ref[i] for i in range(3)]
    w2s = [w2_ref[i] for i in range(3)]
    b1s = [b1_ref[i] for i in range(3)]
    b2s = [b2_ref[i] for i in range(3)]

    def shift(a, s):
      # y[:, t] = a[:, t + s]; zero-filled at the *window* edge only, which is
      # harmless for kept outputs because HALO >= RECEPTIVE_RADIUS.
      # TODO(synk): pltpu.roll would move this onto the otherwise-idle XLU slot
      # (wrap-around garbage is equally harmless thanks to the halo).
      if s == 0:
        return a
      z = jnp.zeros((C, abs(s)), a.dtype)
      if s > 0:
        return jnp.concatenate([a[:, s:], z], axis=1)
      return jnp.concatenate([z, a[:, :W + s]], axis=1)

    def conv(a16, wf, b_col, d):
      # a16: (C, W) bf16 (already boundary-masked).  wf: (C, K*C) bf16 with
      # columns ordered [tap0 | tap1 | tap2], C_in contiguous per tap.
      if fuse_taps:
        xs = jnp.concatenate([shift(a16, -d), a16, shift(a16, d)], axis=0)
        y = jnp.dot(wf, xs, preferred_element_type=jnp.float32)
      else:
        y = jnp.dot(wf[:, :C], shift(a16, -d), preferred_element_type=jnp.float32)
        y = y + jnp.dot(wf[:, C:2 * C], a16, preferred_element_type=jnp.float32)
        y = y + jnp.dot(wf[:, 2 * C:], shift(a16, d),
                        preferred_element_type=jnp.float32)
      return y + b_col                               # f32 accumulation

    def chain(x, masked):
      if masked:
        # Validity mask: 1.0 where the true time index lies in [0, T).
        # Masking every conv input with it reproduces the reference's per-conv
        # "same" zero padding at the true sequence boundaries exactly.
        lane = lax.broadcasted_iota(jnp.int32, (1, W), 1)
        tpos = lane + (j * t_tile - HALO)
        msk = ((tpos >= 0) & (tpos < T)).astype(jnp.float32)
      for i, d in enumerate(DILATIONS):              # static unroll: 3 pairs
        a1 = jax.nn.silu(x)                          # f32 VPU/EUP (v5e-safe)
        if masked:
          a1 = a1 * msk
        z1 = conv(a1.astype(jnp.bfloat16), w1s[i], b1s[i], d)   # convs1[i]
        a2 = jax.nn.silu(z1)
        if masked:
          a2 = a2 * msk
        z2 = conv(a2.astype(jnp.bfloat16), w2s[i], b2s[i], 1)   # convs2[i]
        x = z2 + x                                   # residual, f32 trunk
      # Keep the lane-aligned central t_tile of the window.
      return x[:, HALO:HALO + t_tile].astype(o_ref.dtype)

    # Only the first tile and tiles reaching past T can see positions outside
    # [0, T); interior tiles (the vast majority for long T) skip mask work.
    needs_mask = (j == 0) | ((j + 1) * t_tile + HALO > T)

    @pl.when(needs_mask)
    def _():
      o_ref[0] = chain(x0, True)

    @pl.when(jnp.logical_not(needs_mask))
    def _():
      o_ref[0] = chain(x0, False)

  n_win = B * NT
  out_itemsize = jnp.dtype(out_dtype).itemsize
  cost = pl.CostEstimate(
      flops=int(n_win * 6 * 2 * C * KC * W),
      transcendentals=int(n_win * 6 * C * W),
      # Actual haloed re-read of the bf16 input + output writeback + weights.
      bytes_accessed=int(n_win * C * W * 2 + B * C * T_pad * out_itemsize
                         + w1f.nbytes + w2f.nbytes + b1.nbytes + b2.nbytes),
  )

  vmem_limit = max(32 * 1024 * 1024, int(0.8 * _vmem_capacity_bytes()))
  const3 = lambda shape: pl.BlockSpec(shape, lambda bb, jj: (0, 0, 0))

  # TODO(synk): for tiny C (<= 64) batching nb windows per grid step would
  # further amortize per-step overhead; skipped to keep the grid simple.
  return pl.pallas_call(
      kernel,
      out_shape=jax.ShapeDtypeStruct((B, C, T_pad), out_dtype),
      grid_spec=pltpu.PrefetchScalarGridSpec(
          num_scalar_prefetch=0,
          grid=(B, NT),
          in_specs=[
              pl.BlockSpec(memory_space=pl.ANY),   # x: raw HBM, manual DMA
              const3((3, C, KC)),                  # fused convs1 weights (bf16)
              const3((3, C, 1)),                   # convs1 biases (f32)
              const3((3, C, KC)),                  # fused convs2 weights (bf16)
              const3((3, C, 1)),                   # convs2 biases (f32)
          ],
          out_specs=pl.BlockSpec((1, C, t_tile), lambda b, j: (b, 0, j)),
          scratch_shapes=[
              pltpu.VMEM((2, C, W), jnp.bfloat16),   # double-buffered window
              pltpu.SemaphoreType.DMA((2,)),
          ],
      ),
      compiler_params=pltpu.CompilerParams(
          # B across TensorCores (v7x megacore); time tiles sequential per core
          # so the j+1 window prefetch is well-defined.
          dimension_semantics=("parallel", "arbitrary"),
          vmem_limit_bytes=vmem_limit),
      cost_estimate=cost,
  )(xpad, w1f, b1, w2f, b2)


def resblock1_pallas(x, w1, b1, w2, b2, *, t_tile=None):
  """ResBlock1 forward.  x: (B, C, T); w1/w2: (3, C, C, K); b1/b2: (3, C, 1).

  t_tile: time-tile width (multiple of 128).  Default: generation-aware pick
  (largest tile fitting the VMEM budget, capped by T).
  """
  B, C, T = x.shape
  out_dtype = x.dtype
  if t_tile is None:
    t_tile = _pick_t_tile(C, T, jnp.dtype(out_dtype).itemsize)
  assert t_tile % 128 == 0, "t_tile must be a multiple of 128 (TPU lane width)"
  NT = (T + t_tile - 1) // t_tile
  T_pad = NT * t_tile

  # Tap-fused, lane-dense (C_in last) bf16 weights: (3, C, K*C), column index
  # k*C + c_in.  (weight_norm at init is the identity reparametrization, so
  # plain conv weights are equivalent here.)
  w1f = jnp.transpose(w1, (0, 1, 3, 2)).reshape(3, C, K * C).astype(jnp.bfloat16)
  w2f = jnp.transpose(w2, (0, 1, 3, 2)).reshape(3, C, K * C).astype(jnp.bfloat16)
  b1 = b1.astype(jnp.float32)
  b2 = b2.astype(jnp.float32)

  # Zero-pad time: HALO left, HALO + tail (up to a t_tile multiple) right.
  # bf16 in HBM halves DMA traffic; the kernel upcasts to f32 after the DMA so
  # accumulation / residual math stays f32.  Intentional precision tradeoff
  # (the MXU operands are bf16 anyway).
  xpad = jnp.pad(x.astype(jnp.bfloat16),
                 ((0, 0), (0, 0), (HALO, HALO + (T_pad - T))))

  out = _pallas_resblock1(xpad, w1f, b1, w2f, b2, C=C, T=T, T_pad=T_pad,
                          t_tile=t_tile, out_dtype=out_dtype)
  return out[:, :, :T]


# ----------------------- pure-JAX reference (for checking) -----------------
def resblock1_ref(x, w1, b1, w2, b2):
  for i, d in enumerate(DILATIONS):
    xt = jax.nn.silu(x)
    xt = lax.conv_general_dilated(
        xt, w1[i], (1,), [(d, d)], rhs_dilation=(d,),
        dimension_numbers=("NCH", "OIH", "NCH")) + b1[i][None]
    xt = jax.nn.silu(xt)
    xt = lax.conv_general_dilated(
        xt, w2[i], (1,), [(1, 1)], rhs_dilation=(1,),
        dimension_numbers=("NCH", "OIH", "NCH")) + b2[i][None]
    x = xt + x
  return x


if __name__ == "__main__":
  def run_case(key, B, C, T, t_tile):
    kx, kw1, kb1, kw2, kb2 = jax.random.split(key, 5)
    # Deterministic "checkpoint": conv weights ~ N(0, 0.01) (init_weights),
    # biases small uniform (Conv1d default style).
    x = jax.random.normal(kx, (B, C, T), jnp.float32)
    w1 = 0.01 * jax.random.normal(kw1, (3, C, C, K), jnp.float32)
    w2 = 0.01 * jax.random.normal(kw2, (3, C, C, K), jnp.float32)
    bound = 1.0 / np.sqrt(C * K)
    b1 = jax.random.uniform(kb1, (3, C, 1), jnp.float32,
                            minval=-bound, maxval=bound)
    b2 = jax.random.uniform(kb2, (3, C, 1), jnp.float32,
                            minval=-bound, maxval=bound)

    out = jax.block_until_ready(resblock1_pallas(x, w1, b1, w2, b2,
                                                 t_tile=t_tile))
    ref = resblock1_ref(x, w1, b1, w2, b2)
    # bf16 MXU operands / bf16 input in HBM -> relaxed tolerance vs f32 ref.
    np.testing.assert_allclose(np.asarray(out), np.asarray(ref),
                               rtol=1e-2, atol=2e-2)

  root = jax.random.PRNGKey(0)
  k1, k2 = jax.random.split(root)
  # Multi-tile path: exercises the DMA prefetch chain, masked (boundary) and
  # unmasked (interior) tiles, and the small-C fused-tap matmul.
  run_case(k1, 2, 8, 640, 128)
  # Auto tile selection + large-C (C >= 128) three-accumulating-dots path.
  run_case(k2, 1, 128, 200, None)
  print("KERNEL_OK")
</pallas_src>

<mosaic_0001>
module attributes {stable_mosaic.version = 11 : i64} {
  func.func @kernel(%arg0: i32, %arg1: i32, %arg2: memref<2x8x896xbf16, #tpu.memory_space<any>>, %arg3: memref<3x8x24xbf16, #tpu.memory_space<vmem>>, %arg4: memref<3x8x1xf32, #tpu.memory_space<vmem>>, %arg5: memref<3x8x24xbf16, #tpu.memory_space<vmem>>, %arg6: memref<3x8x1xf32, #tpu.memory_space<vmem>>, %arg7: memref<1x8x128xf32, #tpu.memory_space<vmem>>, %arg8: memref<2x8x384xbf16, #tpu.memory_space<vmem>>, %arg9: memref<2x!tpu.dma_semaphore, #tpu.memory_space<semaphore_mem>>) attributes {dimension_semantics = [#tpu.dimension_semantics<parallel>, #tpu.dimension_semantics<arbitrary>], iteration_bounds = array<i64: 2, 5>, scalar_prefetch = 0 : i64, scratch_operands = 2 : i64, tpu.core_type = #tpu.core_type<tc>, window_params = [{}, {pipeline_mode = #tpu.pipeline_mode<synchronous>, transform_indices = @transform_1, window_bounds = array<i64: 3, 8, 24>}, {pipeline_mode = #tpu.pipeline_mode<synchronous>, transform_indices = @transform_2, window_bounds = array<i64: 3, 8, 1>}, {pipeline_mode = #tpu.pipeline_mode<synchronous>, transform_indices = @transform_3, window_bounds = array<i64: 3, 8, 24>}, {pipeline_mode = #tpu.pipeline_mode<synchronous>, transform_indices = @transform_4, window_bounds = array<i64: 3, 8, 1>}, {transform_indices = @transform_5, window_bounds = array<i64: 1, 8, 128>}]} {
    %c1_i32 = arith.constant 1 : i32
    %0 = arith.andi %arg1, %c1_i32 : i32
    %c0_i32 = arith.constant 0 : i32
    %1 = arith.cmpi eq, %arg1, %c0_i32 : i32
    %2 = arith.extui %1 : i1 to i32
    %c0_i32_0 = arith.constant 0 : i32
    %3 = arith.cmpi ne, %2, %c0_i32_0 : i32
    scf.if %3 {
      %c0_i32_47 = arith.constant 0 : i32
      %53 = tpu.assume_multiple %c0_i32_47, 128 : i32
      %c0_i32_48 = arith.constant 0 : i32
      %54 = tpu.memref_slice %arg2[%arg0, %c0_i32_48, %53] : memref<2x8x896xbf16, #tpu.memory_space<any>> -> memref<1x8x384xbf16, #tpu.memory_space<any>>
      %55 = tpu.memref_squeeze %54 : memref<1x8x384xbf16, #tpu.memory_space<any>> -> memref<8x384xbf16, #tpu.memory_space<any>>
      %c0_i32_49 = arith.constant 0 : i32
      %c0_i32_50 = arith.constant 0 : i32
      %56 = tpu.memref_slice %arg8[%0, %c0_i32_49, %c0_i32_50] : memref<2x8x384xbf16, #tpu.memory_space<vmem>> -> memref<1x8x384xbf16, #tpu.memory_space<vmem>>
      %57 = tpu.memref_squeeze %56 : memref<1x8x384xbf16, #tpu.memory_space<vmem>> -> memref<8x384xbf16, #tpu.memory_space<vmem>>
      %58 = tpu.memref_slice %arg9[%0] : memref<2x!tpu.dma_semaphore, #tpu.memory_space<semaphore_mem>> -> memref<1x!tpu.dma_semaphore, #tpu.memory_space<semaphore_mem>>
      %59 = tpu.memref_squeeze %58 : memref<1x!tpu.dma_semaphore, #tpu.memory_space<semaphore_mem>> -> memref<!tpu.dma_semaphore, #tpu.memory_space<semaphore_mem>>
      tpu.enqueue_dma source(%55 : memref<8x384xbf16, #tpu.memory_space<any>>) target(%57 : memref<8x384xbf16, #tpu.memory_space<vmem>>) target_semaphore(%59 : memref<!tpu.dma_semaphore, #tpu.memory_space<semaphore_mem>>)
    } else {
    }
    %c1_i32_1 = arith.constant 1 : i32
    %4 = arith.addi %arg1, %c1_i32_1 : i32
    %c5_i32 = arith.constant 5 : i32
    %5 = arith.cmpi slt, %4, %c5_i32 : i32
    %6 = arith.extui %5 : i1 to i32
    %c0_i32_2 = arith.constant 0 : i32
    %7 = arith.cmpi ne, %6, %c0_i32_2 : i32
    scf.if %7 {
      %c1_i32_47 = arith.constant 1 : i32
      %53 = arith.addi %arg1, %c1_i32_47 : i32
      %c1_i32_48 = arith.constant 1 : i32
      %54 = arith.subi %c1_i32_48, %0 : i32
      %c128_i32_49 = arith.constant 128 : i32
      %55 = arith.muli %53, %c128_i32_49 : i32
      %56 = tpu.assume_multiple %55, 128 : i32
      %c0_i32_50 = arith.constant 0 : i32
      %57 = tpu.memref_slice %arg2[%arg0, %c0_i32_50, %56] : memref<2x8x896xbf16, #tpu.memory_space<any>> -> memref<1x8x384xbf16, #tpu.memory_space<any>>
      %58 = tpu.memref_squeeze %57 : memref<1x8x384xbf16, #tpu.memory_space<any>> -> memref<8x384xbf16, #tpu.memory_space<any>>
      %c0_i32_51 = arith.constant 0 : i32
      %c0_i32_52 = arith.constant 0 : i32
      %59 = tpu.memref_slice %arg8[%54, %c0_i32_51, %c0_i32_52] : memref<2x8x384xbf16, #tpu.memory_space<vmem>> -> memref<1x8x384xbf16, #tpu.memory_space<vmem>>
      %60 = tpu.memref_squeeze %59 : memref<1x8x384xbf16, #tpu.memory_space<vmem>> -> memref<8x384xbf16, #tpu.memory_space<vmem>>
      %61 = tpu.memref_slice %arg9[%54] : memref<2x!tpu.dma_semaphore, #tpu.memory_space<semaphore_mem>> -> memref<1x!tpu.dma_semaphore, #tpu.memory_space<semaphore_mem>>
      %62 = tpu.memref_squeeze %61 : memref<1x!tpu.dma_semaphore, #tpu.memory_space<semaphore_mem>> -> memref<!tpu.dma_semaphore, #tpu.memory_space<semaphore_mem>>
      tpu.enqueue_dma source(%58 : memref<8x384xbf16, #tpu.memory_space<any>>) target(%60 : memref<8x384xbf16, #tpu.memory_space<vmem>>) target_semaphore(%62 : memref<!tpu.dma_semaphore, #tpu.memory_space<semaphore_mem>>)
    } else {
    }
    %c0_i32_3 = arith.constant 0 : i32
    %c0_i32_4 = arith.constant 0 : i32
    %8 = tpu.memref_slice %arg2[%arg0, %c0_i32_3, %c0_i32_4] : memref<2x8x896xbf16, #tpu.memory_space<any>> -> memref<1x8x384xbf16, #tpu.memory_space<any>>
    %9 = tpu.memref_squeeze %8 : memref<1x8x384xbf16, #tpu.memory_space<any>> -> memref<8x384xbf16, #tpu.memory_space<any>>
    %c0_i32_5 = arith.constant 0 : i32
    %c0_i32_6 = arith.constant 0 : i32
    %10 = tpu.memref_slice %arg8[%0, %c0_i32_5, %c0_i32_6] : memref<2x8x384xbf16, #tpu.memory_space<vmem>> -> memref<1x8x384xbf16, #tpu.memory_space<vmem>>
    %11 = tpu.memref_squeeze %10 : memref<1x8x384xbf16, #tpu.memory_space<vmem>> -> memref<8x384xbf16, #tpu.memory_space<vmem>>
    %12 = tpu.memref_slice %arg9[%0] : memref<2x!tpu.dma_semaphore, #tpu.memory_space<semaphore_mem>> -> memref<1x!tpu.dma_semaphore, #tpu.memory_space<semaphore_mem>>
    %13 = tpu.memref_squeeze %12 : memref<1x!tpu.dma_semaphore, #tpu.memory_space<semaphore_mem>> -> memref<!tpu.dma_semaphore, #tpu.memory_space<semaphore_mem>>
    tpu.wait_dma2 semaphore(%13 : memref<!tpu.dma_semaphore, #tpu.memory_space<semaphore_mem>>) src(%9 : memref<8x384xbf16, #tpu.memory_space<any>>) dst(%11 : memref<8x384xbf16, #tpu.memory_space<vmem>>)
    %14 = arith.index_cast %0 : i32 to index
    %c0 = arith.constant 0 : index
    %c0_7 = arith.constant 0 : index
    %15 = vector.load %arg8[%14, %c0, %c0_7] : memref<2x8x384xbf16, #tpu.memory_space<vmem>>, vector<1x8x384xbf16>
    %16 = vector.shape_cast %15 : vector<1x8x384xbf16> to vector<8x384xbf16>
    %17 = arith.extf %16 : vector<8x384xbf16> to vector<8x384xf32>
    %c0_8 = arith.constant 0 : index
    %c0_9 = arith.constant 0 : index
    %c0_10 = arith.constant 0 : index
    %18 = vector.load %arg3[%c0_8, %c0_9, %c0_10] : memref<3x8x24xbf16, #tpu.memory_space<vmem>>, vector<1x8x24xbf16>
    %19 = vector.shape_cast %18 : vector<1x8x24xbf16> to vector<8x24xbf16>
    %c1 = arith.constant 1 : index
    %c0_11 = arith.constant 0 : index
    %c0_12 = arith.constant 0 : index
    %20 = vector.load %arg3[%c1, %c0_11, %c0_12] : memref<3x8x24xbf16, #tpu.memory_space<vmem>>, vector<1x8x24xbf16>
    %21 = vector.shape_cast %20 : vector<1x8x24xbf16> to vector<8x24xbf16>
    %c2 = arith.constant 2 : index
    %c0_13 = arith.constant 0 : index
    %c0_14 = arith.constant 0 : index
    %22 = vector.load %arg3[%c2, %c0_13, %c0_14] : memref<3x8x24xbf16, #tpu.memory_space<vmem>>, vector<1x8x24xbf16>
    %23 = vector.shape_cast %22 : vector<1x8x24xbf16> to vector<8x24xbf16>
    %c0_15 = arith.constant 0 : index
    %c0_16 = arith.constant 0 : index
    %c0_17 = arith.constant 0 : index
    %24 = vector.load %arg5[%c0_15, %c0_16, %c0_17] : memref<3x8x24xbf16, #tpu.memory_space<vmem>>, vector<1x8x24xbf16>
    %25 = vector.shape_cast %24 : vector<1x8x24xbf16> to vector<8x24xbf16>
    %c1_18 = arith.constant 1 : index
    %c0_19 = arith.constant 0 : index
    %c0_20 = arith.constant 0 : index
    %26 = vector.load %arg5[%c1_18, %c0_19, %c0_20] : memref<3x8x24xbf16, #tpu.memory_space<vmem>>, vector<1x8x24xbf16>
    %27 = vector.shape_cast %26 : vector<1x8x24xbf16> to vector<8x24xbf16>
    %c2_21 = arith.constant 2 : index
    %c0_22 = arith.constant 0 : index
    %c0_23 = arith.constant 0 : index
    %28 = vector.load %arg5[%c2_21, %c0_22, %c0_23] : memref<3x8x24xbf16, #tpu.memory_space<vmem>>, vector<1x8x24xbf16>
    %29 = vector.shape_cast %28 : vector<1x8x24xbf16> to vector<8x24xbf16>
    %c0_24 = arith.constant 0 : index
    %c0_25 = arith.constant 0 : index
    %c0_26 = arith.constant 0 : index
    %30 = vector.load %arg4[%c0_24, %c0_25, %c0_26] : memref<3x8x1xf32, #tpu.memory_space<vmem>>, vector<1x8x1xf32>
    %31 = vector.shape_cast %30 : vector<1x8x1xf32> to vector<8x1xf32>
    %c1_27 = arith.constant 1 : index
    %c0_28 = arith.constant 0 : index
    %c0_29 = arith.constant 0 : index
    %32 = vector.load %arg4[%c1_27, %c0_28, %c0_29] : memref<3x8x1xf32, #tpu.memory_space<vmem>>, vector<1x8x1xf32>
    %33 = vector.shape_cast %32 : vector<1x8x1xf32> to vector<8x1xf32>
    %c2_30 = arith.constant 2 : index
    %c0_31 = arith.constant 0 : index
    %c0_32 = arith.constant 0 : index
    %34 = vector.load %arg4[%c2_30, %c0_31, %c0_32] : memref<3x8x1xf32, #tpu.memory_space<vmem>>, vector<1x8x1xf32>
    %35 = vector.shape_cast %34 : vector<1x8x1xf32> to vector<8x1xf32>
    %c0_33 = arith.constant 0 : index
    %c0_34 = arith.constant 0 : index
    %c0_35 = arith.constant 0 : index
    %36 = vector.load %arg6[%c0_33, %c0_34, %c0_35] : memref<3x8x1xf32, #tpu.memory_space<vmem>>, vector<1x8x1xf32>
    %37 = vector.shape_cast %36 : vector<1x8x1xf32> to vector<8x1xf32>
    %c1_36 = arith.constant 1 : index
    %c0_37 = arith.constant 0 : index
    %c0_38 = arith.constant 0 : index
    %38 = vector.load %arg6[%c1_36, %c0_37, %c0_38] : memref<3x8x1xf32, #tpu.memory_space<vmem>>, vector<1x8x1xf32>
    %39 = vector.shape_cast %38 : vector<1x8x1xf32> to vector<8x1xf32>
    %c2_39 = arith.constant 2 : index
    %c0_40 = arith.constant 0 : index
    %c0_41 = arith.constant 0 : index
    %40 = vector.load %arg6[%c2_39, %c0_40, %c0_41] : memref<3x8x1xf32, #tpu.memory_space<vmem>>, vector<1x8x1xf32>
    %41 = vector.shape_cast %40 : vector<1x8x1xf32> to vector<8x1xf32>
    %c0_i32_42 = arith.constant 0 : i32
    %42 = arith.cmpi eq, %arg1, %c0_i32_42 : i32
    %c1_i32_43 = arith.constant 1 : i32
    %43 = arith.addi %arg1, %c1_i32_43 : i32
    %c128_i32 = arith.constant 128 : i32
    %44 = arith.muli %43, %c128_i32 : i32
    %c128_i32_44 = arith.constant 128 : i32
    %45 = arith.addi %44, %c128_i32_44 : i32
    %c640_i32 = arith.constant 640 : i32
    %46 = arith.cmpi sgt, %45, %c640_i32 : i32
    %47 = arith.ori %42, %46 : i1
    %48 = arith.extui %47 : i1 to i32
    %c0_i32_45 = arith.constant 0 : i32
    %49 = arith.cmpi ne, %48, %c0_i32_45 : i32
    scf.if %49 {
      %53 = tpu.iota {dimensions = array<i32: 1>} : vector<1x384xi32>
      %c128_i32_47 = arith.constant 128 : i32
      %54 = arith.muli %arg1, %c128_i32_47 : i32
      %c128_i32_48 = arith.constant 128 : i32
      %55 = arith.subi %54, %c128_i32_48 : i32
      %56 = vector.broadcast %55 : i32 to vector<1x384xi32>
      %57 = arith.addi %53, %56 : vector<1x384xi32>
      %c0_i32_49 = arith.constant 0 : i32
      %58 = vector.broadcast %c0_i32_49 : i32 to vector<1x384xi32>
      %59 = arith.cmpi sge, %57, %58 : vector<1x384xi32>
      %c640_i32_50 = arith.constant 640 : i32
      %60 = vector.broadcast %c640_i32_50 : i32 to vector<1x384xi32>
      %61 = arith.cmpi slt, %57, %60 : vector<1x384xi32>
      %62 = arith.andi %59, %61 : vector<1x384xi1>
      %63 = arith.extui %62 : vector<1x384xi1> to vector<1x384xi32>
      %64 = arith.sitofp %63 : vector<1x384xi32> to vector<1x384xf32>
      %65 = arith.negf %17 : vector<8x384xf32>
      %66 = math.exp %65 : vector<8x384xf32>
      %cst = arith.constant 1.000000e+00 : f32
      %67 = vector.broadcast %cst : f32 to vector<8x384xf32>
      %68 = arith.addf %67, %66 : vector<8x384xf32>
      %69 = arith.divf %67, %68 : vector<8x384xf32>
      %70 = arith.mulf %17, %69 : vector<8x384xf32>
      %71 = vector.broadcast %64 : vector<1x384xf32> to vector<8x384xf32>
      %72 = arith.mulf %70, %71 : vector<8x384xf32>
      %73 = arith.truncf %72 : vector<8x384xf32> to vector<8x384xbf16>
      %cst_51 = arith.constant 0.000000e+00 : bf16
      %74 = vector.broadcast %cst_51 : bf16 to vector<8x1xbf16>
      %75 = vector.extract_strided_slice %73 {offsets = [0, 0], sizes = [8, 383], strides = [1, 1]} : vector<8x384xbf16> to vector<8x383xbf16>
      %76 = tpu.concatenate %74, %75 in 1 : vector<8x1xbf16>, vector<8x383xbf16> -> vector<8x384xbf16>
      %cst_52 = arith.constant 0.000000e+00 : bf16
      %77 = vector.broadcast %cst_52 : bf16 to vector<8x1xbf16>
      %78 = vector.extract_strided_slice %73 {offsets = [0, 1], sizes = [8, 383], strides = [1, 1]} : vector<8x384xbf16> to vector<8x383xbf16>
      %79 = tpu.concatenate %78, %77 in 1 : vector<8x383xbf16>, vector<8x1xbf16> -> vector<8x384xbf16>
      %80 = tpu.concatenate %76, %73, %79 in 0 : vector<8x384xbf16>, vector<8x384xbf16>, vector<8x384xbf16> -> vector<24x384xbf16>
      %cst_53 = arith.constant dense<0.000000e+00> : vector<8x384xf32>
      %81 = tpu.matmul %19, %80, %cst_53 {dimension_numbers = #tpu.dot_dimension_numbers<[1], [0], [0], [1], [0, 0, 1, 1], [], []>} : vector<8x24xbf16>, vector<24x384xbf16>, vector<8x384xf32> -> vector<8x384xf32>
      %82 = vector.broadcast %31 : vector<8x1xf32> to vector<8x384xf32>
      %83 = arith.addf %81, %82 : vector<8x384xf32>
      %84 = arith.negf %83 : vector<8x384xf32>
      %85 = math.exp %84 : vector<8x384xf32>
      %cst_54 = arith.constant 1.000000e+00 : f32
      %86 = vector.broadcast %cst_54 : f32 to vector<8x384xf32>
      %87 = arith.addf %86, %85 : vector<8x384xf32>
      %88 = arith.divf %86, %87 : vector<8x384xf32>
      %89 = arith.mulf %83, %88 : vector<8x384xf32>
      %90 = vector.broadcast %64 : vector<1x384xf32> to vector<8x384xf32>
      %91 = arith.mulf %89, %90 : vector<8x384xf32>
      %92 = arith.truncf %91 : vector<8x384xf32> to vector<8x384xbf16>
      %cst_55 = arith.constant 0.000000e+00 : bf16
      %93 = vector.broadcast %cst_55 : bf16 to vector<8x1xbf16>
      %94 = vector.extract_strided_slice %92 {offsets = [0, 0], sizes = [8, 383], strides = [1, 1]} : vector<8x384xbf16> to vector<8x383xbf16>
      %95 = tpu.concatenate %93, %94 in 1 : vector<8x1xbf16>, vector<8x383xbf16> -> vector<8x384xbf16>
      %cst_56 = arith.constant 0.000000e+00 : bf16
      %96 = vector.broadcast %cst_56 : bf16 to vector<8x1xbf16>
      %97 = vector.extract_strided_slice %92 {offsets = [0, 1], sizes = [8, 383], strides = [1, 1]} : vector<8x384xbf16> to vector<8x383xbf16>
      %98 = tpu.concatenate %97, %96 in 1 : vector<8x383xbf16>, vector<8x1xbf16> -> vector<8x384xbf16>
      %99 = tpu.concatenate %95, %92, %98 in 0 : vector<8x384xbf16>, vector<8x384xbf16>, vector<8x384xbf16> -> vector<24x384xbf16>
      %cst_57 = arith.constant dense<0.000000e+00> : vector<8x384xf32>
      %100 = tpu.matmul %25, %99, %cst_57 {dimension_numbers = #tpu.dot_dimension_numbers<[1], [0], [0], [1], [0, 0, 1, 1], [], []>} : vector<8x24xbf16>, vector<24x384xbf16>, vector<8x384xf32> -> vector<8x384xf32>
      %101 = vector.broadcast %37 : vector<8x1xf32> to vector<8x384xf32>
      %102 = arith.addf %100, %101 : vector<8x384xf32>
      %103 = arith.addf %102, %17 : vector<8x384xf32>
      %104 = arith.negf %103 : vector<8x384xf32>
      %105 = math.exp %104 : vector<8x384xf32>
      %cst_58 = arith.constant 1.000000e+00 : f32
      %106 = vector.broadcast %cst_58 : f32 to vector<8x384xf32>
      %107 = arith.addf %106, %105 : vector<8x384xf32>
      %108 = arith.divf %106, %107 : vector<8x384xf32>
      %109 = arith.mulf %103, %108 : vector<8x384xf32>
      %110 = vector.broadcast %64 : vector<1x384xf32> to vector<8x384xf32>
      %111 = arith.mulf %109, %110 : vector<8x384xf32>
      %112 = arith.truncf %111 : vector<8x384xf32> to vector<8x384xbf16>
      %cst_59 = arith.constant 0.000000e+00 : bf16
      %113 = vector.broadcast %cst_59 : bf16 to vector<8x3xbf16>
      %114 = vector.extract_strided_slice %112 {offsets = [0, 0], sizes = [8, 381], strides = [1, 1]} : vector<8x384xbf16> to vector<8x381xbf16>
      %115 = tpu.concatenate %113, %114 in 1 : vector<8x3xbf16>, vector<8x381xbf16> -> vector<8x384xbf16>
      %cst_60 = arith.constant 0.000000e+00 : bf16
      %116 = vector.broadcast %cst_60 : bf16 to vector<8x3xbf16>
      %117 = vector.extract_strided_slice %112 {offsets = [0, 3], sizes = [8, 381], strides = [1, 1]} : vector<8x384xbf16> to vector<8x381xbf16>
      %118 = tpu.concatenate %117, %116 in 1 : vector<8x381xbf16>, vector<8x3xbf16> -> vector<8x384xbf16>
      %119 = tpu.concatenate %115, %112, %118 in 0 : vector<8x384xbf16>, vector<8x384xbf16>, vector<8x384xbf16> -> vector<24x384xbf16>
      %cst_61 = arith.constant dense<0.000000e+00> : vector<8x384xf32>
      %120 = tpu.matmul %21, %119, %cst_61 {dimension_numbers = #tpu.dot_dimension_numbers<[1], [0], [0], [1], [0, 0, 1, 1], [], []>} : vector<8x24xbf16>, vector<24x384xbf16>, vector<8x384xf32> -> vector<8x384xf32>
      %121 = vector.broadcast %33 : vector<8x1xf32> to vector<8x384xf32>
      %122 = arith.addf %120, %121 : vector<8x384xf32>
      %123 = arith.negf %122 : vector<8x384xf32>
      %124 = math.exp %123 : vector<8x384xf32>
      %cst_62 = arith.constant 1.000000e+00 : f32
      %125 = vector.broadcast %cst_62 : f32 to vector<8x384xf32>
      %126 = arith.addf %125, %124 : vector<8x384xf32>
      %127 = arith.divf %125, %126 : vector<8x384xf32>
      %128 = arith.mulf %122, %127 : vector<8x384xf32>
      %129 = vector.broadcast %64 : vector<1x384xf32> to vector<8x384xf32>
      %130 = arith.mulf %128, %129 : vector<8x384xf32>
      %131 = arith.truncf %130 : vector<8x384xf32> to vector<8x384xbf16>
      %cst_63 = arith.constant 0.000000e+00 : bf16
      %132 = vector.broadcast %cst_63 : bf16 to vector<8x1xbf16>
      %133 = vector.extract_strided_slice %131 {offsets = [0, 0], sizes = [8, 383], strides = [1, 1]} : vector<8x384xbf16> to vector<8x383xbf16>
      %134 = tpu.concatenate %132, %133 in 1 : vector<8x1xbf16>, vector<8x383xbf16> -> vector<8x384xbf16>
      %cst_64 = arith.constant 0.000000e+00 : bf16
      %135 = vector.broadcast %cst_64 : bf16 to vector<8x1xbf16>
      %136 = vector.extract_strided_slice %131 {offsets = [0, 1], sizes = [8, 383], strides = [1, 1]} : vector<8x384xbf16> to vector<8x383xbf16>
      %137 = tpu.concatenate %136, %135 in 1 : vector<8x383xbf16>, vector<8x1xbf16> -> vector<8x384xbf16>
      %138 = tpu.concatenate %134, %131, %137 in 0 : vector<8x384xbf16>, vector<8x384xbf16>, vector<8x384xbf16> -> vector<24x384xbf16>
      %cst_65 = arith.constant dense<0.000000e+00> : vector<8x384xf32>
      %139 = tpu.matmul %27, %138, %cst_65 {dimension_numbers = #tpu.dot_dimension_numbers<[1], [0], [0], [1], [0, 0, 1, 1], [], []>} : vector<8x24xbf16>, vector<24x384xbf16>, vector<8x384xf32> -> vector<8x384xf32>
      %140 = vector.broadcast %39 : vector<8x1xf32> to vector<8x384xf32>
      %141 = arith.addf %139, %140 : vector<8x384xf32>
      %142 = arith.addf %141, %103 : vector<8x384xf32>
      %143 = arith.negf %142 : vector<8x384xf32>
      %144 = math.exp %143 : vector<8x384xf32>
      %cst_66 = arith.constant 1.000000e+00 : f32
      %145 = vector.broadcast %cst_66 : f32 to vector<8x384xf32>
      %146 = arith.addf %145, %144 : vector<8x384xf32>
      %147 = arith.divf %145, %146 : vector<8x384xf32>
      %148 = arith.mulf %142, %147 : vector<8x384xf32>
      %149 = vector.broadcast %64 : vector<1x384xf32> to vector<8x384xf32>
      %150 = arith.mulf %148, %149 : vector<8x384xf32>
      %151 = arith.truncf %150 : vector<8x384xf32> to vector<8x384xbf16>
      %cst_67 = arith.constant 0.000000e+00 : bf16
      %152 = vector.broadcast %cst_67 : bf16 to vector<8x5xbf16>
      %153 = vector.extract_strided_slice %151 {offsets = [0, 0], sizes = [8, 379], strides = [1, 1]} : vector<8x384xbf16> to vector<8x379xbf16>
      %154 = tpu.concatenate %152, %153 in 1 : vector<8x5xbf16>, vector<8x379xbf16> -> vector<8x384xbf16>
      %cst_68 = arith.constant 0.000000e+00 : bf16
      %155 = vector.broadcast %cst_68 : bf16 to vector<8x5xbf16>
      %156 = vector.extract_strided_slice %151 {offsets = [0, 5], sizes = [8, 379], strides = [1, 1]} : vector<8x384xbf16> to vector<8x379xbf16>
      %157 = tpu.concatenate %156, %155 in 1 : vector<8x379xbf16>, vector<8x5xbf16> -> vector<8x384xbf16>
      %158 = tpu.concatenate %154, %151, %157 in 0 : vector<8x384xbf16>, vector<8x384xbf16>, vector<8x384xbf16> -> vector<24x384xbf16>
      %cst_69 = arith.constant dense<0.000000e+00> : vector<8x384xf32>
      %159 = tpu.matmul %23, %158, %cst_69 {dimension_numbers = #tpu.dot_dimension_numbers<[1], [0], [0], [1], [0, 0, 1, 1], [], []>} : vector<8x24xbf16>, vector<24x384xbf16>, vector<8x384xf32> -> vector<8x384xf32>
      %160 = vector.broadcast %35 : vector<8x1xf32> to vector<8x384xf32>
      %161 = arith.addf %159, %160 : vector<8x384xf32>
      %162 = arith.negf %161 : vector<8x384xf32>
      %163 = math.exp %162 : vector<8x384xf32>
      %cst_70 = arith.constant 1.000000e+00 : f32
      %164 = vector.broadcast %cst_70 : f32 to vector<8x384xf32>
      %165 = arith.addf %164, %163 : vector<8x384xf32>
      %166 = arith.divf %164, %165 : vector<8x384xf32>
      %167 = arith.mulf %161, %166 : vector<8x384xf32>
      %168 = vector.broadcast %64 : vector<1x384xf32> to vector<8x384xf32>
      %169 = arith.mulf %167, %168 : vector<8x384xf32>
      %170 = arith.truncf %169 : vector<8x384xf32> to vector<8x384xbf16>
      %cst_71 = arith.constant 0.000000e+00 : bf16
      %171 = vector.broadcast %cst_71 : bf16 to vector<8x1xbf16>
      %172 = vector.extract_strided_slice %170 {offsets = [0, 0], sizes = [8, 383], strides = [1, 1]} : vector<8x384xbf16> to vector<8x383xbf16>
      %173 = tpu.concatenate %171, %172 in 1 : vector<8x1xbf16>, vector<8x383xbf16> -> vector<8x384xbf16>
      %cst_72 = arith.constant 0.000000e+00 : bf16
      %174 = vector.broadcast %cst_72 : bf16 to vector<8x1xbf16>
      %175 = vector.extract_strided_slice %170 {offsets = [0, 1], sizes = [8, 383], strides = [1, 1]} : vector<8x384xbf16> to vector<8x383xbf16>
      %176 = tpu.concatenate %175, %174 in 1 : vector<8x383xbf16>, vector<8x1xbf16> -> vector<8x384xbf16>
      %177 = tpu.concatenate %173, %170, %176 in 0 : vector<8x384xbf16>, vector<8x384xbf16>, vector<8x384xbf16> -> vector<24x384xbf16>
      %cst_73 = arith.constant dense<0.000000e+00> : vector<8x384xf32>
      %178 = tpu.matmul %29, %177, %cst_73 {dimension_numbers = #tpu.dot_dimension_numbers<[1], [0], [0], [1], [0, 0, 1, 1], [], []>} : vector<8x24xbf16>, vector<24x384xbf16>, vector<8x384xf32> -> vector<8x384xf32>
      %179 = vector.broadcast %41 : vector<8x1xf32> to vector<8x384xf32>
      %180 = arith.addf %178, %179 : vector<8x384xf32>
      %181 = arith.addf %180, %142 : vector<8x384xf32>
      %182 = vector.extract_strided_slice %181 {offsets = [0, 128], sizes = [8, 128], strides = [1, 1]} : vector<8x384xf32> to vector<8x128xf32>
      %c0_74 = arith.constant 0 : index
      %c0_75 = arith.constant 0 : index
      %c0_76 = arith.constant 0 : index
      %183 = vector.load %arg7[%c0_74, %c0_75, %c0_76] : memref<1x8x128xf32, #tpu.memory_space<vmem>>, vector<1x8x128xf32>
      %184 = vector.shape_cast %183 : vector<1x8x128xf32> to vector<8x128xf32>
      %185 = vector.shape_cast %182 : vector<8x128xf32> to vector<1x8x128xf32>
      tpu.vector_store %arg7[%c0_74, %c0_75, %c0_76], %185 {strides = array<i32>} : memref<1x8x128xf32, #tpu.memory_space<vmem>>, vector<1x8x128xf32>,
    } else {
    }
    %true = arith.constant true
    %50 = arith.xori %47, %true : i1
    %51 = arith.extui %50 : i1 to i32
    %c0_i32_46 = arith.constant 0 : i32
    %52 = arith.cmpi ne, %51, %c0_i32_46 : i32
    scf.if %52 {
      %53 = arith.negf %17 : vector<8x384xf32>
      %54 = math.exp %53 : vector<8x384xf32>
      %cst = arith.constant 1.000000e+00 : f32
      %55 = vector.broadcast %cst : f32 to vector<8x384xf32>
      %56 = arith.addf %55, %54 : vector<8x384xf32>
      %57 = arith.divf %55, %56 : vector<8x384xf32>
      %58 = arith.mulf %17, %57 : vector<8x384xf32>
      %59 = arith.truncf %58 : vector<8x384xf32> to vector<8x384xbf16>
      %cst_47 = arith.constant 0.000000e+00 : bf16
      %60 = vector.broadcast %cst_47 : bf16 to vector<8x1xbf16>
      %61 = vector.extract_strided_slice %59 {offsets = [0, 0], sizes = [8, 383], strides = [1, 1]} : vector<8x384xbf16> to vector<8x383xbf16>
      %62 = tpu.concatenate %60, %61 in 1 : vector<8x1xbf16>, vector<8x383xbf16> -> vector<8x384xbf16>
      %cst_48 = arith.constant 0.000000e+00 : bf16
      %63 = vector.broadcast %cst_48 : bf16 to vector<8x1xbf16>
      %64 = vector.extract_strided_slice %59 {offsets = [0, 1], sizes = [8, 383], strides = [1, 1]} : vector<8x384xbf16> to vector<8x383xbf16>
      %65 = tpu.concatenate %64, %63 in 1 : vector<8x383xbf16>, vector<8x1xbf16> -> vector<8x384xbf16>
      %66 = tpu.concatenate %62, %59, %65 in 0 : vector<8x384xbf16>, vector<8x384xbf16>, vector<8x384xbf16> -> vector<24x384xbf16>
      %cst_49 = arith.constant dense<0.000000e+00> : vector<8x384xf32>
      %67 = tpu.matmul %19, %66, %cst_49 {dimension_numbers = #tpu.dot_dimension_numbers<[1], [0], [0], [1], [0, 0, 1, 1], [], []>} : vector<8x24xbf16>, vector<24x384xbf16>, vector<8x384xf32> -> vector<8x384xf32>
      %68 = vector.broadcast %31 : vector<8x1xf32> to vector<8x384xf32>
      %69 = arith.addf %67, %68 : vector<8x384xf32>
      %70 = arith.negf %69 : vector<8x384xf32>
      %71 = math.exp %70 : vector<8x384xf32>
      %cst_50 = arith.constant 1.000000e+00 : f32
      %72 = vector.broadcast %cst_50 : f32 to vector<8x384xf32>
      %73 = arith.addf %72, %71 : vector<8x384xf32>
      %74 = arith.divf %72, %73 : vector<8x384xf32>
      %75 = arith.mulf %69, %74 : vector<8x384xf32>
      %76 = arith.truncf %75 : vector<8x384xf32> to vector<8x384xbf16>
      %cst_51 = arith.constant 0.000000e+00 : bf16
      %77 = vector.broadcast %cst_51 : bf16 to vector<8x1xbf16>
      %78 = vector.extract_strided_slice %76 {offsets = [0, 0], sizes = [8, 383], strides = [1, 1]} : vector<8x384xbf16> to vector<8x383xbf16>
      %79 = tpu.concatenate %77, %78 in 1 : vector<8x1xbf16>, vector<8x383xbf16> -> vector<8x384xbf16>
      %cst_52 = arith.constant 0.000000e+00 : bf16
      %80 = vector.broadcast %cst_52 : bf16 to vector<8x1xbf16>
      %81 = vector.extract_strided_slice %76 {offsets = [0, 1], sizes = [8, 383], strides = [1, 1]} : vector<8x384xbf16> to vector<8x383xbf16>
      %82 = tpu.concatenate %81, %80 in 1 : vector<8x383xbf16>, vector<8x1xbf16> -> vector<8x384xbf16>
      %83 = tpu.concatenate %79, %76, %82 in 0 : vector<8x384xbf16>, vector<8x384xbf16>, vector<8x384xbf16> -> vector<24x384xbf16>
      %cst_53 = arith.constant dense<0.000000e+00> : vector<8x384xf32>
      %84 = tpu.matmul %25, %83, %cst_53 {dimension_numbers = #tpu.dot_dimension_numbers<[1], [0], [0], [1], [0, 0, 1, 1], [], []>} : vector<8x24xbf16>, vector<24x384xbf16>, vector<8x384xf32> -> vector<8x384xf32>
      %85 = vector.broadcast %37 : vector<8x1xf32> to vector<8x384xf32>
      %86 = arith.addf %84, %85 : vector<8x384xf32>
      %87 = arith.addf %86, %17 : vector<8x384xf32>
      %88 = arith.negf %87 : vector<8x384xf32>
      %89 = math.exp %88 : vector<8x384xf32>
      %cst_54 = arith.constant 1.000000e+00 : f32
      %90 = vector.broadcast %cst_54 : f32 to vector<8x384xf32>
      %91 = arith.addf %90, %89 : vector<8x384xf32>
      %92 = arith.divf %90, %91 : vector<8x384xf32>
      %93 = arith.mulf %87, %92 : vector<8x384xf32>
      %94 = arith.truncf %93 : vector<8x384xf32> to vector<8x384xbf16>
      %cst_55 = arith.constant 0.000000e+00 : bf16
      %95 = vector.broadcast %cst_55 : bf16 to vector<8x3xbf16>
      %96 = vector.extract_strided_slice %94 {offsets = [0, 0], sizes = [8, 381], strides = [1, 1]} : vector<8x384xbf16> to vector<8x381xbf16>
      %97 = tpu.concatenate %95, %96 in 1 : vector<8x3xbf16>, vector<8x381xbf16> -> vector<8x384xbf16>
      %cst_56 = arith.constant 0.000000e+00 : bf16
      %98 = vector.broadcast %cst_56 : bf16 to vector<8x3xbf16>
      %99 = vector.extract_strided_slice %94 {offsets = [0, 3], sizes = [8, 381], strides = [1, 1]} : vector<8x384xbf16> to vector<8x381xbf16>
      %100 = tpu.concatenate %99, %98 in 1 : vector<8x381xbf16>, vector<8x3xbf16> -> vector<8x384xbf16>
      %101 = tpu.concatenate %97, %94, %100 in 0 : vector<8x384xbf16>, vector<8x384xbf16>, vector<8x384xbf16> -> vector<24x384xbf16>
      %cst_57 = arith.constant dense<0.000000e+00> : vector<8x384xf32>
      %102 = tpu.matmul %21, %101, %cst_57 {dimension_numbers = #tpu.dot_dimension_numbers<[1], [0], [0], [1], [0, 0, 1, 1], [], []>} : vector<8x24xbf16>, vector<24x384xbf16>, vector<8x384xf32> -> vector<8x384xf32>
      %103 = vector.broadcast %33 : vector<8x1xf32> to vector<8x384xf32>
      %104 = arith.addf %102, %103 : vector<8x384xf32>
      %105 = arith.negf %104 : vector<8x384xf32>
      %106 = math.exp %105 : vector<8x384xf32>
      %cst_58 = arith.constant 1.000000e+00 : f32
      %107 = vector.broadcast %cst_58 : f32 to vector<8x384xf32>
      %108 = arith.addf %107, %106 : vector<8x384xf32>
      %109 = arith.divf %107, %108 : vector<8x384xf32>
      %110 = arith.mulf %104, %109 : vector<8x384xf32>
      %111 = arith.truncf %110 : vector<8x384xf32> to vector<8x384xbf16>
      %cst_59 = arith.constant 0.000000e+00 : bf16
      %112 = vector.broadcast %cst_59 : bf16 to vector<8x1xbf16>
      %113 = vector.extract_strided_slice %111 {offsets = [0, 0], sizes = [8, 383], strides = [1, 1]} : vector<8x384xbf16> to vector<8x383xbf16>
      %114 = tpu.concatenate %112, %113 in 1 : vector<8x1xbf16>, vector<8x383xbf16> -> vector<8x384xbf16>
      %cst_60 = arith.constant 0.000000e+00 : bf16
      %115 = vector.broadcast %cst_60 : bf16 to vector<8x1xbf16>
      %116 = vector.extract_strided_slice %111 {offsets = [0, 1], sizes = [8, 383], strides = [1, 1]} : vector<8x384xbf16> to vector<8x383xbf16>
      %117 = tpu.concatenate %116, %115 in 1 : vector<8x383xbf16>, vector<8x1xbf16> -> vector<8x384xbf16>
      %118 = tpu.concatenate %114, %111, %117 in 0 : vector<8x384xbf16>, vector<8x384xbf16>, vector<8x384xbf16> -> vector<24x384xbf16>
      %cst_61 = arith.constant dense<0.000000e+00> : vector<8x384xf32>
      %119 = tpu.matmul %27, %118, %cst_61 {dimension_numbers = #tpu.dot_dimension_numbers<[1], [0], [0], [1], [0, 0, 1, 1], [], []>} : vector<8x24xbf16>, vector<24x384xbf16>, vector<8x384xf32> -> vector<8x384xf32>
      %120 = vector.broadcast %39 : vector<8x1xf32> to vector<8x384xf32>
      %121 = arith.addf %119, %120 : vector<8x384xf32>
      %122 = arith.addf %121, %87 : vector<8x384xf32>
      %123 = arith.negf %122 : vector<8x384xf32>
      %124 = math.exp %123 : vector<8x384xf32>
      %cst_62 = arith.constant 1.000000e+00 : f32
      %125 = vector.broadcast %cst_62 : f32 to vector<8x384xf32>
      %126 = arith.addf %125, %124 : vector<8x384xf32>
      %127 = arith.divf %125, %126 : vector<8x384xf32>
      %128 = arith.mulf %122, %127 : vector<8x384xf32>
      %129 = arith.truncf %128 : vector<8x384xf32> to vector<8x384xbf16>
      %cst_63 = arith.constant 0.000000e+00 : bf16
      %130 = vector.broadcast %cst_63 : bf16 to vector<8x5xbf16>
      %131 = vector.extract_strided_slice %129 {offsets = [0, 0], sizes = [8, 379], strides = [1, 1]} : vector<8x384xbf16> to vector<8x379xbf16>
      %132 = tpu.concatenate %130, %131 in 1 : vector<8x5xbf16>, vector<8x379xbf16> -> vector<8x384xbf16>
      %cst_64 = arith.constant 0.000000e+00 : bf16
      %133 = vector.broadcast %cst_64 : bf16 to vector<8x5xbf16>
      %134 = vector.extract_strided_slice %129 {offsets = [0, 5], sizes = [8, 379], strides = [1, 1]} : vector<8x384xbf16> to vector<8x379xbf16>
      %135 = tpu.concatenate %134, %133 in 1 : vector<8x379xbf16>, vector<8x5xbf16> -> vector<8x384xbf16>
      %136 = tpu.concatenate %132, %129, %135 in 0 : vector<8x384xbf16>, vector<8x384xbf16>, vector<8x384xbf16> -> vector<24x384xbf16>
      %cst_65 = arith.constant dense<0.000000e+00> : vector<8x384xf32>
      %137 = tpu.matmul %23, %136, %cst_65 {dimension_numbers = #tpu.dot_dimension_numbers<[1], [0], [0], [1], [0, 0, 1, 1], [], []>} : vector<8x24xbf16>, vector<24x384xbf16>, vector<8x384xf32> -> vector<8x384xf32>
      %138 = vector.broadcast %35 : vector<8x1xf32> to vector<8x384xf32>
      %139 = arith.addf %137, %138 : vector<8x384xf32>
      %140 = arith.negf %139 : vector<8x384xf32>
      %141 = math.exp %140 : vector<8x384xf32>
      %cst_66 = arith.constant 1.000000e+00 : f32
      %142 = vector.broadcast %cst_66 : f32 to vector<8x384xf32>
      %143 = arith.addf %142, %141 : vector<8x384xf32>
      %144 = arith.divf %142, %143 : vector<8x384xf32>
      %145 = arith.mulf %139, %144 : vector<8x384xf32>
      %146 = arith.truncf %145 : vector<8x384xf32> to vector<8x384xbf16>
      %cst_67 = arith.constant 0.000000e+00 : bf16
      %147 = vector.broadcast %cst_67 : bf16 to vector<8x1xbf16>
      %148 = vector.extract_strided_slice %146 {offsets = [0, 0], sizes = [8, 383], strides = [1, 1]} : vector<8x384xbf16> to vector<8x383xbf16>
      %149 = tpu.concatenate %147, %148 in 1 : vector<8x1xbf16>, vector<8x383xbf16> -> vector<8x384xbf16>
      %cst_68 = arith.constant 0.000000e+00 : bf16
      %150 = vector.broadcast %cst_68 : bf16 to vector<8x1xbf16>
      %151 = vector.extract_strided_slice %146 {offsets = [0, 1], sizes = [8, 383], strides = [1, 1]} : vector<8x384xbf16> to vector<8x383xbf16>
      %152 = tpu.concatenate %151, %150 in 1 : vector<8x383xbf16>, vector<8x1xbf16> -> vector<8x384xbf16>
      %153 = tpu.concatenate %149, %146, %152 in 0 : vector<8x384xbf16>, vector<8x384xbf16>, vector<8x384xbf16> -> vector<24x384xbf16>
      %cst_69 = arith.constant dense<0.000000e+00> : vector<8x384xf32>
      %154 = tpu.matmul %29, %153, %cst_69 {dimension_numbers = #tpu.dot_dimension_numbers<[1], [0], [0], [1], [0, 0, 1, 1], [], []>} : vector<8x24xbf16>, vector<24x384xbf16>, vector<8x384xf32> -> vector<8x384xf32>
      %155 = vector.broadcast %41 : vector<8x1xf32> to vector<8x384xf32>
      %156 = arith.addf %154, %155 : vector<8x384xf32>
      %157 = arith.addf %156, %122 : vector<8x384xf32>
      %158 = vector.extract_strided_slice %157 {offsets = [0, 128], sizes = [8, 128], strides = [1, 1]} : vector<8x384xf32> to vector<8x128xf32>
      %c0_70 = arith.constant 0 : index
      %c0_71 = arith.constant 0 : index
      %c0_72 = arith.constant 0 : index
      %159 = vector.load %arg7[%c0_70, %c0_71, %c0_72] : memref<1x8x128xf32, #tpu.memory_space<vmem>>, vector<1x8x128xf32>
      %160 = vector.shape_cast %159 : vector<1x8x128xf32> to vector<8x128xf32>
      %161 = vector.shape_cast %158 : vector<8x128xf32> to vector<1x8x128xf32>
      tpu.vector_store %arg7[%c0_70, %c0_71, %c0_72], %161 {strides = array<i32>} : memref<1x8x128xf32, #tpu.memory_space<vmem>>, vector<1x8x128xf32>,
    } else {
    }
    return
  }
  func.func @transform_1(%arg0: i32, %arg1: i32) -> (i32, i32, i32) {
    %c0_i32 = arith.constant 0 : i32
    %c0_i32_0 = arith.constant 0 : i32
    %c0_i32_1 = arith.constant 0 : i32
    %c0_i32_2 = arith.constant 0 : i32
    return %c0_i32, %c0_i32_0, %c0_i32_1 : i32, i32, i32
  }
  func.func @transform_2(%arg0: i32, %arg1: i32) -> (i32, i32, i32) {
    %c0_i32 = arith.constant 0 : i32
    %c0_i32_0 = arith.constant 0 : i32
    %c0_i32_1 = arith.constant 0 : i32
    %c0_i32_2 = arith.constant 0 : i32
    return %c0_i32, %c0_i32_0, %c0_i32_1 : i32, i32, i32
  }
  func.func @transform_3(%arg0: i32, %arg1: i32) -> (i32, i32, i32) {
    %c0_i32 = arith.constant 0 : i32
    %c0_i32_0 = arith.constant 0 : i32
    %c0_i32_1 = arith.constant 0 : i32
    %c0_i32_2 = arith.constant 0 : i32
    return %c0_i32, %c0_i32_0, %c0_i32_1 : i32, i32, i32
  }
  func.func @transform_4(%arg0: i32, %arg1: i32) -> (i32, i32, i32) {
    %c0_i32 = arith.constant 0 : i32
    %c0_i32_0 = arith.constant 0 : i32
    %c0_i32_1 = arith.constant 0 : i32
    %c0_i32_2 = arith.constant 0 : i32
    return %c0_i32, %c0_i32_0, %c0_i32_1 : i32, i32, i32
  }
  func.func @transform_5(%arg0: i32, %arg1: i32) -> (i32, i32, i32) {
    %c0_i32 = arith.constant 0 : i32
    %c0_i32_0 = arith.constant 0 : i32
    return %arg0, %c0_i32, %arg1 : i32, i32, i32
  }
}

</mosaic_0001>

<bundles_post_ra>
// kernel: tpu_custom_call.1
= control target key start
LH: loop header
LB: loop body
LE: loop exit
PB: predicated region body
PF: predicated region fallthrough
CT: control target
= control target key end

     0   :  { %s3581_s0 = inlined_call_operand.hbm [shape: bf16[2,8,896], index: 0, kind: input, shape index: {}]   ;;  %s3582_s1 = inlined_call_operand.vmem [shape: bf16[3,8,24], index: 1, kind: input, shape index: {}]   ;;  %s3583_s2 = inlined_call_operand.vmem [shape: f32[3,8,1], index: 2, kind: input, shape index: {}]   ;;  %s3584_s3 = inlined_call_operand.vmem [shape: bf16[3,8,24], index: 3, kind: input, shape index: {}]   ;;  %s3585_s4 = inlined_call_operand.vmem [shape: f32[3,8,1], index: 4, kind: input, shape index: {}]   ;;  %s3586_s5 = inlined_call_operand.hbm [shape: f32[2,8,640], index: 5, kind: output, shape index: {}]  }
   0x1   :  { %3604 = sst [smem:[#allocation24_spill]] %s3586_s5 }
   0x2   :  { %10 = vsyncpa [#allocation5], 0 }
   0x3   :  { %12 = vsyncpa [#allocation5 + $0x1], 0  ;;  %s2934_s18 = smov 0   ;;  %s2936_s19 = smov 0  }
   0x4   :  { %s2938_s20 = smov 0   ;;  %s2940_s21 = smov 0  }
   0x5   :  { %s2942_s22 = smov 0   ;;  %s2944_s23 = smov 0  }
   0x6   :  { %s2946_s24 = smov 0   ;;  %s2948_s25 = smov 0  }
   0x7 LB: > { %3605 = sst [smem:[#allocation14_spill]] %s2854_s18  ;;  %s2271_s26 = sadd.s32 4294967295, %s2882_s25   ;;  %s2882_s25 = sphi %s2948_s25, %s18_s25   ;;  %s2878_s24 = sphi %s2946_s24, %s3637_s24   ;;  %s2874_s23 = sphi %s2944_s23, %s3636_s23   ;;  %s2870_s22 = sphi %s2942_s22, %s3635_s22   ;;  %s2866_s21 = sphi %s2940_s21, %s3634_s21   ;;  %s2862_s20 = sphi %s2938_s20, %s3633_s20   ;;  %s2858_s19 = sphi %s2936_s19, %s3639_s19   ;;  %s2854_s18 = sphi %s2934_s18, %s3638_s18  }
   0x8   : > { %3606 = sst [smem:[#allocation15_spill]] %s2862_s20  ;;  %s2272_s27 = sadd.s32 4294967294, %s2882_s25  }
   0x9   : > { %3607 = sst [smem:[#allocation16_spill]] %s2874_s23  ;;  %s27_s28 = sadd.s32 1, %s2874_s23 }
   0xa   : > { %3608 = sst [smem:[#allocation17_spill]] %s2878_s24  ;;  %p28_p0 = scmp.ge.s32.totalorder %s27_s28, 5 }
   0xb   : > { %3609 = sst [smem:[#allocation18_spill]] %s2882_s25  ;;  %s30_s29 = sadd.s32 1, %s2878_s24 }
   0xc   : > { %p133_p1 = scmp.ne.s32.totalorder %s2862_s20, %s2858_s19  ;;  %p134_p2 = scmp.eq.s32.totalorder %s2271_s26, 9 }
   0xd   : > { %s3641_s28 = smov (%p28_p0, %s27_s28), 0  ;;  %s3643_s29 = smov (!%p28_p0, %s30_s29), %s2878_s24 }
   0xe   : > { %3610 = sst [smem:[#allocation19_spill]] %s3641_s28  ;;  %s119_s30 = ssub.s32 %s2874_s23, %s3641_s28 }
   0xf   : > { %p2985_p3 = por %p134_p2, %p133_p1  ;;  %p32_p4 = scmp.ge.s32.totalorder %s3643_s29, 2 }
  0x10   : > { %p139_p5 = scmp.ne.s32.totalorder %s2858_s19, %s2854_s18  ;;  %p140_p6 = scmp.eq.s32.totalorder %s2272_s27, 9 }
  0x11   : > { %s3611_s6 = scalar_select %p2985_p3, 1, 0 }
  0x12   : > { %p2274_p7 = scmp.ge.s32.totalorder %s2882_s25, 1  ;;  %s3645_s29 = smov (%p32_p4, %s3643_s29), 0 }
  0x13   : > { %3612 = sst [smem:[#allocation20_spill]] %s3611_s6  ;;  %p2994_p8 = por %p140_p6, %p139_p5 }
  0x14   : > { %3613 = sst [smem:[#allocation21_spill]] %s3645_s29  ;;  %p170_p9 = scmp.lt.s32.totalorder %s2882_s25, 11 }
  0x15   : > { %s3614_s7 = scalar_select %p2994_p8, 1, 0 }
  0x16   : > { %s118_s8 = ssub.s32 %s2878_s24, %s3645_s29  ;;  %s123_s9 = sadd.s32 1, %s2862_s20 }
  0x17   : > { %3615 = sst [smem:[#allocation22_spill]] %s3614_s7  ;;  %s120_s10 = sor.u32 %s119_s30, %s118_s8 }
  0x18   : > { %p171_p10 = pnand %p2274_p7, %p170_p9  ;;  %p121_p11 = scmp.eq.s32.totalorder %s120_s10, 0 }
  0x19   : > { %s3587_s12 = sand.u32 (!%p171_p10), 1, %s2858_s19   ;;  %s3007_s13 = sand.u32 (!%p171_p10), 1, %s2866_s21 }
  0x1a   : > { %s3003_s11 = scalar_select %p121_p11, %s2862_s20, %s123_s9  }
  0x1b   : > { %174 = sbr.rel (%p171_p10) target bundleno = 4478 (0x117e), region = 36  ;;  %s3011_s14 = sshll.u32 (!%p171_p10), %s3587_s12, 3 }
  0x1c   : > { %3616 = sst [smem:[#allocation23_spill]] %s3003_s11  ;;  %p3603_p12 = scmp.eq.s32.totalorder (!%p171_p10), %s2866_s21, 0 }
  0x1d   : > { %s2374_s15 = smul.u32 (!%p171_p10), 448, %s2870_s22  ;;  %s216_s17 = sadd.s32 (!%p171_p10), 1, %s2866_s21 }
  0x1e   : > { %s2375_s16 = smul.u32 (!%p171_p10), 12, %s3007_s13  ;;  %p3022_p13 = scmp.lt.s32.totalorder (!%p171_p10), %s216_s17, 5 }
  0x1f   : > { %s3020_s30 = scalar_lea.hbm (!%p171_p10), %s3581_s0, %s2374_s15  ;;  %s3602_s29 = sshll.u32 (!%p171_p10), %s2866_s21, 7 }
  0x20   : > { %s3026_s9 = scalar_lea.vmem [#allocation2], %s2375_s16  ;;  %s3032_s28 = scalar_lea.sflag [#allocation3], %s3007_s13 }
  0x21   : > { %s212_s10 = sshll.u32 %s3026_s9, 4  ;;  %s2736_s24 = scalar_lea.hbm %s3020_s30, 192  ;;  %s213_s10 = int_to_ptr.vmem [resolvable:$true] %s212_s10 }
  0x22   : > { %p2737_p0 = scmp.ne.s32.totalorder %s3020_s30, %s2736_s24  ;;  %s3593_s17 = scalar_lea.hbm %s3581_s0, 896 }
  0x23   : > { %p2741_p4 = scmp.lt.s32.totalorder %s3020_s30, %s3581_s0  ;;  %p2742_p5 = scmp.lt.s32.totalorder %s3593_s17, %s2736_s24 }
  0x24   : > { %p2738_p1 = pnand %p2737_p0, %p3603_p12 }
  0x25   : > { %p2743_p6 = por %p2742_p5, %p2741_p4 }
  0x26   : > { %p2739_p2 = pneg %p2738_p1 }
  0x28   : > { %p2744_p7 = pnand %p2743_p6, %p2739_p2 }
  0x2a   : > { %2747 = shalt.err (!%p2744_p7)  }
  0x2b   : > { %s2748_s12 = scalar_lea.vmem %s213_s10, 192  ;;  %s2884_s15 = smov [#allocation2]  }
  0x2c   : > { %p2749_p9 = scmp.ne.s32.totalorder %s213_s10, %s2748_s12  ;;  %s2752_s26 = sshll.u32 %s2884_s15, 4  ;;  %s3051_s26 = int_to_ptr.vmem [resolvable:$false] %s2752_s26 }
  0x2d   : > { %s3592_s23 = scalar_lea.vmem %s3051_s26, 384  ;;  %p2755_p0 = scmp.lt.s32.totalorder %s213_s10, %s3051_s26 }
  0x2e   : > { %p2750_p10 = pnand %p2749_p9, %p3603_p12  ;;  %p2756_p1 = scmp.lt.s32.totalorder %s3592_s23, %s2748_s12 }
  0x30   : > { %p2751_p11 = pneg %p2750_p10  ;;  %p2757_p4 = por %p2756_p1, %p2755_p0 }
  0x32   : > { %p2758_p2 = pnand %p2757_p4, %p2751_p11 }
  0x34   : > { %2761 = shalt.err (!%p2758_p2)  }
  0x35   : > { %2494 = dma.hbm_to_vmem [thread:$0]  (%p3603_p12), %s3020_s30, 192, %s213_s10, %s3032_s28 }
  0x36   : > { %s3063_s24 = sadd.s32 128, %s3602_s29  ;;  %s225_s11 = smul.u32 7, %s2870_s22 }
  0x37   : > { %s223_s27 = sshra.s32 %s3063_s24, 7  ;;  %s3618_s12 = ssub.s32 1, %s3007_s13 }
  0x38   : > { %s2378_s16 = smul.u32 12, %s3618_s12  ;;  %s226_s15 = sadd.s32 %s225_s11, %s223_s27 }
  0x39   : > { %s2281_s23 = sshll.u32 %s226_s15, 6  ;;  %s3619_s5 = smov %s3618_s12 }
  0x3a   : > { %s228_s7 = scalar_lea.hbm %s3581_s0, %s2281_s23  ;;  %s231_s18 = scalar_lea.vmem [#allocation2], %s2378_s16 }
  0x3b   : > { %s240_s25 = sshll.u32 %s231_s18, 4  ;;  %s232_s6 = scalar_lea.sflag [#allocation3], %s3619_s5  ;;  %s241_s25 = int_to_ptr.vmem [resolvable:$true] %s240_s25 }
  0x3c   : > { %s2762_s30 = scalar_lea.hbm %s228_s7, 192  ;;  %p2767_p9 = scmp.lt.s32.totalorder %s228_s7, %s3581_s0 }
  0x3d   : > { %p2763_p5 = scmp.ne.s32.totalorder %s228_s7, %s2762_s30  ;;  %s3620_s12 = scalar_lea.hbm %s3581_s0, 896 }
  0x3e   : > { %p2768_p10 = scmp.lt.s32.totalorder %s3620_s12, %s2762_s30 }
  0x3f   : > { %p2764_p6 = pnand %p2763_p5, %p3022_p13 }
  0x40   : > { %p2769_p11 = por %p2768_p10, %p2767_p9 }
  0x41   : > { %p2765_p7 = pneg %p2764_p6 }
  0x43   : > { %p2770_p0 = pnand %p2769_p11, %p2765_p7 }
  0x45   : > { %2773 = shalt.err (!%p2770_p0)  }
  0x46   : > { %s2774_s18 = scalar_lea.vmem %s241_s25, 192  ;;  %p2781_p5 = scmp.lt.s32.totalorder %s241_s25, %s3051_s26 }
  0x47   : > { %p2775_p1 = scmp.ne.s32.totalorder %s241_s25, %s2774_s18  ;;  %s3621_s5 = scalar_lea.vmem %s3051_s26, 384 }
  0x48   : > { %p2782_p6 = scmp.lt.s32.totalorder %s3621_s5, %s2774_s18 }
  0x49   : > { %p2776_p4 = pnand %p2775_p1, %p3022_p13 }
  0x4a   : > { %p2783_p12 = por %p2782_p6, %p2781_p5 }
  0x4b   : > { %p2777_p2 = pneg %p2776_p4 }
  0x4d   : > { %p2784_p8 = pnand %p2783_p12, %p2777_p2 }
  0x4f   : > { %2787 = shalt.err (!%p2784_p8)  }
  0x50   : > { %2496 = dma.hbm_to_vmem [thread:$0]  (%p3022_p13), %s228_s7, 192, %s241_s25, %s232_s6 }
  0x51   : > { %s3091_s20 = scalar_lea.vmem [#allocation4], %s3011_s14 }
  0x52   : > { %2846 = dma.done.wait %s3032_s28, 192 }
  0x53   : > { %2847 = vsyncadd %s3032_s28, 4294967104  ;;  %s278_s29 = sadd.s32 128, %s3063_s24  ;;  %p3622_p9 = scmp.eq.s32.totalorder %s2866_s21, 0  ;;  %v252_v0 = vld [vmem:[%s3026_s9] sm:$0xff]  ;;  %v253_v1 = vld [vmem:[%s3026_s9 + $0x8] sm:$0xf] }
  0x54   : > { %p279_p7 = scmp.gt.s32.totalorder %s278_s29, 640  ;;  %v3107_v2 = vld [vmem:[%s3582_s1] sm:$0xf]  ;;  %v3109_v3 = vunpack.c.l.bf16 %v252_v0  ;;  %v3111_v4 = vunpack.c.h.bf16 %v252_v0  ;;  %v3113_v5 = vunpack.c.l.bf16 %v253_v1  ;;  %v3118_v6 = vld [vmem:[%s3582_s1 + $0x4] sm:$0xf]  ;;  %v3148_v12 = vld [vmem:[%s3583_s2 + $0x8] sm:$0xff] }
  0x55   : > { %v3123_v7 = vld [vmem:[%s3582_s1 + $0x8] sm:$0xf]  ;;  %v3128_v8 = vld [vmem:[%s3584_s3] sm:$0xf]  ;;  %v3133_v9 = vld [vmem:[%s3584_s3 + $0x4] sm:$0xf] }
  0x56   : > { %p3098_p10 = por %p279_p7, %p3622_p9  ;;  %v3138_v10 = vld [vmem:[%s3584_s3 + $0x8] sm:$0xf]  ;;  %v3143_v11 = vld [vmem:[%s3583_s2] sm:$0xff]  ;;  %v3153_v13 = vld [vmem:[%s3583_s2 + $0x10] sm:$0xff] }
  0x57   : > { %v3158_v14 = vld [vmem:[%s3585_s4] sm:$0xff]  ;;  %v3163_v15 = vld [vmem:[%s3585_s4 + $0x8] sm:$0xff]  ;;  %v3168_v16 = vld [vmem:[%s3585_s4 + $0x10] sm:$0xff]  ;;  %v2298_v17 = vmul.f32 (%p3098_p10), -1.442695, %v3109_v3  ;;  %v2885_v20 = vmov (%p3098_p10), 0.0   ;;  %v284_v21 = vlaneseq (%p3098_p10) }
  0x58   : > { %283 = sbr.rel (!%p3098_p10) target bundleno = 2273 (0x8e1), region = 56  ;;  %v2300_v18 = vmul.f32 (%p3098_p10), -1.442695, %v3113_v5  ;;  %v2299_v19 = vmul.f32 (%p3098_p10), -1.442695, %v3111_v4  ;;  %2412 = vmatprep.subr.bf16.mxu1 (%p3098_p10), %v2885_v20  ;;  %s3624_s6 = sshll.u32 (%p3098_p10), %s2866_s21, 7 }
  0x59   : > { %2590 = vpow2.f32 (%p3098_p10), %v2298_v17  ;;  %v285_v22 = vand.u32 (%p3098_p10), 127, %v284_v21  ;;  %s2294_s7 = sadd.s32 (%p3098_p10), 4294967168, %s3624_s6  ;;  %vm2886_vm9 = vmmov (%p3098_p10), 0   ;;  %v2887_v49 = vmov (%p3098_p10), 0   ;;  %s2888_s14 = smov (%p3098_p10), 127  }
  0x5a   : > { %2592 = vpow2.f32 (%p3098_p10), %v2300_v18  ;;  %v290_v28 = vstv (%p3098_p10), %s2294_s7  ;;  %2416 = vmatprep.mubr.msk.bf16.mxu1 (%p3098_p10), %vm2886_vm9, %v2885_v20  ;;  %428 = vmatprep.mubr.bf16.mxu0 (%p3098_p10), %v2887_v49  ;;  %s2889_s9 = smov (%p3098_p10), 1   ;;  %vm358_vm10 = vcmask (%p3098_p10), 1039360   ;;  %vm367_vm11 = vcmask (%p3098_p10), 1043456   ;;  %s2890_s17 = smov (%p3098_p10), 125  }
  0x5b   : > { %2594 = vpow2.f32 (%p3098_p10), %v2299_v19  ;;  %v287_v29 = vadd.s32 (%p3098_p10), 256, %v285_v22  ;;  %v286_v31 = vadd.s32 (%p3098_p10), 128, %v285_v22  ;;  %v291_v32 = vadd.s32 (%p3098_p10), %v290_v28, %v285_v22  ;;  %2589 = vset.pattern.permute.xlu1 (%p3098_p10), %v2887_v49  ;;  %2588 = vset.pattern.permute.xlu0 (%p3098_p10), %v2887_v49  ;;  %s2891_s26 = smov (%p3098_p10), 3   ;;  %s2892_s23 = smov (%p3098_p10), 123  }
  0x5c   : > { %vm345_vm12 = vcmask (%p3098_p10), 7168   ;;  %vm384_vm13 = vcmask (%p3098_p10), 195584   ;;  %vm689_vm14 = vcmask (%p3098_p10), 1022976   ;;  %vm677_vm15 = vcmask (%p3098_p10), 23552   ;;  %s2893_s24 = smov (%p3098_p10), 5  }
  0x5d   : > { %v293_v33 = vadd.s32 %v290_v28, %v287_v29  ;;  %v292_v34 = vadd.s32 %v290_v28, %v286_v31  ;;  %vm294_vm0 = vcmp.ge.s32.totalorder %v291_v32, 0  ;;  %vm297_vm1 = vcmp.lt.s32.totalorder %v291_v32, 640 }
  0x5e   : > { %vm300_vm6 = vmand %vm294_vm0, %vm297_vm1  ;;  %vm1018_vm0 = vcmask 1006592   ;;  %vm1006_vm1 = vcmask 39936  }
  0x5f   : > { %vm296_vm2 = vcmp.ge.s32.totalorder %v293_v33, 0  ;;  %vm299_vm3 = vcmp.lt.s32.totalorder %v293_v33, 640  ;;  %vm295_vm4 = vcmp.ge.s32.totalorder %v292_v34, 0  ;;  %vm298_vm5 = vcmp.lt.s32.totalorder %v292_v34, 640 }
  0x60   : > { %vm302_vm7 = vmand %vm296_vm2, %vm299_vm3  ;;  %v3179_v36 = vsel %vm300_vm6, 1.0, %v2885_v20 }
  0x61   : > { %vm301_vm8 = vmand %vm295_vm4, %vm298_vm5  ;;  %v3183_v39 = vsel %vm302_vm7, 1.0, %v2885_v20 }
  0x62   : > { %v3187_v42 = vsel %vm301_vm8, 1.0, %v2885_v20 }
  0x66   : > { %v2591_v23 = vpop.eup %2590 }
  0x67   : > { %v2593_v24 = vpop.eup %2592  ;;  %v318_v25 = vadd.f32 1.0, %v2591_v23 }
  0x68   : > { %v2595_v26 = vpop.eup %2594  ;;  %v320_v27 = vadd.f32 1.0, %v2593_v24 }
  0x69   : > { %2596 = vrcp.f32 %v318_v25  ;;  %v319_v30 = vadd.f32 1.0, %v2595_v26 }
  0x6a   : > { %2598 = vrcp.f32 %v320_v27 }
  0x6b   : > { %2600 = vrcp.f32 %v319_v30 }
  0x76   : > { %v2597_v35 = vpop.eup %2596 }
  0x77   : > { %v2599_v37 = vpop.eup %2598  ;;  %v327_v38 = vmul.f32 %v2597_v35, %v3109_v3 }
  0x78   : > { %v2601_v40 = vpop.eup %2600  ;;  %v329_v41 = vmul.f32 %v2599_v37, %v3113_v5 }
  0x79   : > { %v330_v43 = vmul.f32 %v3179_v36, %v327_v38  ;;  %v328_v44 = vmul.f32 %v2601_v40, %v3111_v4 }
  0x7a   : > { %v332_v45 = vmul.f32 %v3183_v39, %v329_v41 }
  0x7b   : > { %v333_v46 = vpack.c.bf16 %v330_v43, %v330_v43  ;;  %v331_v47 = vmul.f32 %v3187_v42, %v328_v44 }
  0x7c   : > { %v335_v48 = vpack.c.bf16 %v332_v45, %v332_v45 }
  0x7d   : > { %352 = vrot.lane.b32.xlu0 %v333_v46, %s2888_s14  ;;  %v334_v50 = vpack.c.bf16 %v331_v47, %v331_v47  ;;  %v364_v59 = vrot.slane %v333_v46, 4 }
  0x7e   : > { %356 = vrot.lane.b32.xlu1 %v335_v48, %s2888_s14  ;;  %v366_v63 = vrot.slane %v335_v48, 4 }
  0x7f   : > { %v365_v62 = vrot.slane %v334_v50, 4 }
  0x81   : > { %354 = vrot.lane.b32.xlu0 %v334_v50, %s2888_s14 }
  0x82   : > { %339 = vrot.lane.b32.xlu1 %v333_v46, %s2889_s9 }
  0x85   : > { %341 = vrot.lane.b32.xlu0 %v334_v50, %s2889_s9 }
  0x86   : > { %343 = vrot.lane.b32.xlu1 %v335_v48, %s2889_s9 }
  0x89   : > { %381 = vperm.xlu0 %2588, %v3143_v11  }
  0xef   : > { %v353_v51 = vpop.permute.xlu0 %352 }
  0xf0   : > { %v357_v52 = vpop.permute.xlu1 %356 }
  0xf1   : > { %v363_v53 = vsel %vm358_vm10, %v357_v52, 0 }
  0xf2   : > { %v394_v54 = vsel %vm367_vm11, %v363_v53, 0 }
  0xf3   : > { %v355_v55 = vpop.permute.xlu0 %354  ;;  %2413 = vmatpush3.bf16.msra.mxu1 %v394_v54 }
  0xf4   : > { %v340_v56 = vpop.permute.xlu1 %339  ;;  %v360_v57 = vsel %vm358_vm10, %v355_v55, %v357_v52  ;;  %v359_v58 = vsel %vm358_vm10, %v353_v51, %v355_v55  ;;  %2414 = vmatprep.subr.bf16.mxu1 %v2885_v20 }
  0xf5   : > { %v351_v60 = vsel %vm345_vm12, 0, %v340_v56  ;;  %2301 = vmatprep.subr.msk.bf16.mxu0 %vm367_vm11, %v360_v57  ;;  %v389_v61 = vsel %vm367_vm11, %v359_v58, 0 }
  0xf6   : > { %409 = vmatpush1.bf16.msra.mxu0 %v389_v61  ;;  %v369_v18 = vsel %vm367_vm11, %v351_v60, %v364_v59 }
  0xf7   : > { %v342_v0 = vpop.permute.xlu0 %341 }
  0xf8   : > { %v344_v1 = vpop.permute.xlu1 %343  ;;  %v346_v17 = vsel %vm345_vm12, %v340_v56, %v342_v0 }
  0xf9   : > { %v347_v19 = vsel %vm345_vm12, %v342_v0, %v344_v1  ;;  %v373_v21 = vsel %vm367_vm11, %v346_v17, %v365_v62 }
  0xfa   : > { %410 = vmatprep.subr.bf16.mxu0 %v373_v21  ;;  %v377_v22 = vsel %vm367_vm11, %v347_v19, %v366_v63 }
  0xfb   : > { %2415 = vmatpush3.bf16.msra.mxu1 %v377_v22  ;;  %411 = vmatpush1.bf16.msra.mxu0 %v369_v18 }
  0xfc   : > { %2420 = vmatprep.subr.bf16.mxu1 %v2885_v20 }
  0xfe   : > { %2417 = vmatmul.mubr.msk.bf16.vlgmr.msra.gmra.mxu1 %vm384_vm13, %v3107_v2  ;;  %2302 = vmatmul.mubr.msk.bf16.vlgmr.msra.gmra.mxu0 %vm384_vm13, %v3107_v2 }
  0xff   : > { %589 = vmatprep.mubr.bf16.mxu0 %v2887_v49  ;;  %2424 = vmatprep.mubr.msk.bf16.mxu1 %vm2886_vm9, %v2885_v20 }
 0x104   : > { %v382_v23 = vpop.permute.xlu0 %381 }
 0x1be   : > { %v471_v24 = vpop.f32.mrf.mxu1  ;;  %v430_v25 = vpop.f32.mrf.mxu0 }
 0x1bf   : > { %v472_v26 = vadd.f32 %v471_v24, %v382_v23  ;;  %v431_v27 = vadd.f32 %v430_v25, %v382_v23 }
 0x1c0   : > { %v2418_v28 = vpop.f32.mrf.mxu1  ;;  %v432_v29 = vpop.f32.mrf.mxu0 }
 0x1c1   : > { %v2306_v30 = vmul.f32 -1.442695, %v472_v26  ;;  %v2304_v31 = vmul.f32 -1.442695, %v431_v27  ;;  %v433_v32 = vadd.f32 %v432_v29, %v382_v23 }
 0x1c2   : > { %v474_v33 = vpop.f32.mrf.mxu1  ;;  %v434_v34 = vpop.f32.mrf.mxu0 }
 0x1c3   : > { %2602 = vpow2.f32 %v2306_v30  ;;  %v2305_v35 = vmul.f32 -1.442695, %v433_v32 }
 0x1c4   : > { %2604 = vpow2.f32 %v2304_v31  ;;  %v2419_v37 = vpop.f32.mrf.mxu1  ;;  %v435_v38 = vpop.f32.mrf.mxu0 }
 0x1c5   : > { %2606 = vpow2.f32 %v2305_v35 }
 0x1d0   : > { %v2603_v40 = vpop.eup %2602 }
 0x1d1   : > { %v2605_v41 = vpop.eup %2604  ;;  %v488_v43 = vadd.f32 1.0, %v2603_v40 }
 0x1d2   : > { %v2607_v44 = vpop.eup %2606  ;;  %v486_v45 = vadd.f32 1.0, %v2605_v41 }
 0x1d3   : > { %2608 = vrcp.f32 %v488_v43  ;;  %v487_v46 = vadd.f32 1.0, %v2607_v44 }
 0x1d4   : > { %2610 = vrcp.f32 %v486_v45 }
 0x1d5   : > { %2612 = vrcp.f32 %v487_v46 }
 0x1e0   : > { %v2609_v47 = vpop.eup %2608 }
 0x1e1   : > { %v2611_v48 = vpop.eup %2610  ;;  %v497_v50 = vmul.f32 %v2609_v47, %v472_v26 }
 0x1e2   : > { %v2613_v51 = vpop.eup %2612  ;;  %v495_v52 = vmul.f32 %v2611_v48, %v431_v27 }
 0x1e3   : > { %v496_v53 = vmul.f32 %v2613_v51, %v433_v32  ;;  %v500_v54 = vmul.f32 %v3183_v39, %v497_v50 }
 0x1e4   : > { %v498_v55 = vmul.f32 %v3179_v36, %v495_v52 }
 0x1e5   : > { %v503_v56 = vpack.c.bf16 %v500_v54, %v500_v54  ;;  %v499_v57 = vmul.f32 %v3187_v42, %v496_v53 }
 0x1e6   : > { %v501_v58 = vpack.c.bf16 %v498_v55, %v498_v55 }
 0x1e7   : > { %521 = vrot.lane.b32.xlu0 %v503_v56, %s2888_s14  ;;  %v502_v59 = vpack.c.bf16 %v499_v57, %v499_v57  ;;  %v529_v29 = vrot.slane %v503_v56, 4 }
 0x1e8   : > { %517 = vrot.lane.b32.xlu1 %v501_v58, %s2888_s14  ;;  %v527_v23 = vrot.slane %v501_v58, 4 }
 0x1e9   : > { %v528_v22 = vrot.slane %v502_v59, 4 }
 0x1eb   : > { %509 = vrot.lane.b32.xlu0 %v502_v59, %s2889_s9 }
 0x1ec   : > { %519 = vrot.lane.b32.xlu1 %v502_v59, %s2888_s14 }
 0x1ef   : > { %543 = vperm.xlu0 %2588, %v3158_v14  }
 0x1f0   : > { %507 = vrot.lane.b32.xlu1 %v501_v58, %s2889_s9 }
 0x1f4   : > { %511 = vrot.lane.b32.xlu1 %v503_v56, %s2889_s9 }
 0x259   : > { %v522_v60 = vpop.permute.xlu0 %521 }
 0x25a   : > { %v526_v61 = vsel %vm358_vm10, %v522_v60, 0  ;;  %v518_v62 = vpop.permute.xlu1 %517 }
 0x25b   : > { %v555_v63 = vsel %vm367_vm11, %v526_v61, 0 }
 0x25c   : > { %2421 = vmatpush3.bf16.msra.mxu1 %v555_v63 }
 0x25d   : > { %2422 = vmatprep.subr.bf16.mxu1 %v2885_v20  ;;  %v510_v19 = vpop.permute.xlu0 %509 }
 0x25e   : > { %v520_v0 = vpop.permute.xlu1 %519 }
 0x25f   : > { %v523_v1 = vsel %vm358_vm10, %v518_v62, %v520_v0  ;;  %v524_v17 = vsel %vm358_vm10, %v520_v0, %v522_v60 }
 0x260   : > { %v550_v18 = vsel %vm367_vm11, %v523_v1, 0  ;;  %2307 = vmatprep.subr.msk.bf16.mxu0 %vm367_vm11, %v524_v17 }
 0x261   : > { %570 = vmatpush1.bf16.msra.mxu0 %v550_v18 }
 0x262   : > { %v508_v21 = vpop.permute.xlu1 %507 }
 0x263   : > { %v513_v24 = vsel %vm345_vm12, %v508_v21, %v510_v19  ;;  %v516_v25 = vsel %vm345_vm12, 0, %v508_v21 }
 0x264   : > { %v535_v26 = vsel %vm367_vm11, %v513_v24, %v528_v22  ;;  %v531_v27 = vsel %vm367_vm11, %v516_v25, %v527_v23 }
 0x265   : > { %571 = vmatprep.subr.bf16.mxu0 %v535_v26 }
 0x266   : > { %v512_v28 = vpop.permute.xlu1 %511  ;;  %572 = vmatpush1.bf16.msra.mxu0 %v531_v27 }
 0x267   : > { %v514_v30 = vsel %vm345_vm12, %v510_v19, %v512_v28 }
 0x268   : > { %v539_v31 = vsel %vm367_vm11, %v514_v30, %v529_v29 }
 0x269   : > { %2308 = vmatmul.mubr.msk.bf16.vlgmr.msra.gmra.mxu0 %vm384_vm13, %v3128_v8  ;;  %2423 = vmatpush3.bf16.msra.mxu1 %v539_v31 }
 0x26a   : > { %2428 = vmatprep.subr.bf16.mxu1 %v2885_v20  ;;  %757 = vmatprep.mubr.bf16.mxu0 %v2887_v49  ;;  %v544_v32 = vpop.permute.xlu0 %543 }
 0x26c   : > { %2425 = vmatmul.mubr.msk.bf16.vlgmr.msra.gmra.mxu1 %vm384_vm13, %v3128_v8 }
 0x26d   : > { %2432 = vmatprep.mubr.msk.bf16.mxu1 %vm2886_vm9, %v2885_v20 }
 0x329   : > { %v591_v33 = vpop.f32.mrf.mxu0 }
 0x32a   : > { %v592_v34 = vadd.f32 %v591_v33, %v544_v32 }
 0x32b   : > { %v593_v35 = vpop.f32.mrf.mxu0 }
 0x32c   : > { %v3258_v37 = vadd.f32 %v592_v34, %v3109_v3  ;;  %v594_v38 = vadd.f32 %v593_v35, %v544_v32  ;;  %v632_v40 = vpop.f32.mrf.mxu1 }
 0x32d   : > { %v633_v41 = vadd.f32 %v632_v40, %v544_v32  ;;  %v595_v43 = vpop.f32.mrf.mxu0 }
 0x32e   : > { %v2310_v44 = vmul.f32 -1.442695, %v3258_v37  ;;  %v3262_v45 = vadd.f32 %v594_v38, %v3111_v4  ;;  %v2426_v46 = vpop.f32.mrf.mxu1 }
 0x32f   : > { %v3265_v47 = vadd.f32 %v633_v41, %v3113_v5  ;;  %v596_v48 = vpop.f32.mrf.mxu0 }
 0x330   : > { %2614 = vpow2.f32 %v2310_v44  ;;  %v2311_v50 = vmul.f32 -1.442695, %v3262_v45  ;;  %v635_v51 = vpop.f32.mrf.mxu1 }
 0x331   : > { %v2312_v52 = vmul.f32 -1.442695, %v3265_v47 }
 0x332   : > { %2616 = vpow2.f32 %v2311_v50  ;;  %v2427_v53 = vpop.f32.mrf.mxu1 }
 0x333   : > { %2618 = vpow2.f32 %v2312_v52 }
 0x33d   : > { %v2615_v54 = vpop.eup %2614 }
 0x33e   : > { %v650_v55 = vadd.f32 1.0, %v2615_v54 }
 0x33f   : > { %v2617_v56 = vpop.eup %2616 }
 0x340   : > { %v2619_v57 = vpop.eup %2618  ;;  %2620 = vrcp.f32 %v650_v55  ;;  %v651_v58 = vadd.f32 1.0, %v2617_v56 }
 0x341   : > { %v652_v59 = vadd.f32 1.0, %v2619_v57 }
 0x342   : > { %2622 = vrcp.f32 %v651_v58 }
 0x343   : > { %2624 = vrcp.f32 %v652_v59 }
 0x34d   : > { %v2621_v60 = vpop.eup %2620 }
 0x34e   : > { %v659_v63 = vmul.f32 %v2621_v60, %v3258_v37 }
 0x34f   : > { %v2623_v61 = vpop.eup %2622 }
 0x350   : > { %v2625_v62 = vpop.eup %2624  ;;  %v660_v0 = vmul.f32 %v2623_v61, %v3262_v45  ;;  %v662_v21 = vmul.f32 %v3179_v36, %v659_v63 }
 0x351   : > { %v661_v1 = vmul.f32 %v2625_v62, %v3265_v47 }
 0x352   : > { %v663_v17 = vmul.f32 %v3187_v42, %v660_v0  ;;  %v665_v23 = vpack.c.bf16 %v662_v21, %v662_v21 }
 0x353   : > { %v664_v18 = vmul.f32 %v3183_v39, %v661_v1 }
 0x354   : > { %v666_v19 = vpack.c.bf16 %v663_v17, %v663_v17  ;;  %v695_v44 = vrot.slane %v665_v23, 4 }
 0x355   : > { %v667_v22 = vpack.c.bf16 %v664_v18, %v664_v18 }
 0x356   : > { %685 = vrot.lane.b32.xlu0 %v666_v19, %s2890_s17  ;;  %v696_v38 = vrot.slane %v666_v19, 4 }
 0x357   : > { %687 = vrot.lane.b32.xlu1 %v667_v22, %s2890_s17  ;;  %v697_v40 = vrot.slane %v667_v22, 4 }
 0x35a   : > { %671 = vrot.lane.b32.xlu0 %v665_v23, %s2891_s26 }
 0x35b   : > { %683 = vrot.lane.b32.xlu1 %v665_v23, %s2890_s17 }
 0x35e   : > { %675 = vrot.lane.b32.xlu0 %v667_v22, %s2891_s26 }
 0x35f   : > { %673 = vrot.lane.b32.xlu1 %v666_v19, %s2891_s26 }
 0x363   : > { %711 = vperm.xlu1 %2589, %v3148_v12  }
 0x3c8   : > { %v686_v24 = vpop.permute.xlu0 %685 }
 0x3c9   : > { %v688_v25 = vpop.permute.xlu1 %687 }
 0x3ca   : > { %v691_v26 = vsel %vm689_vm14, %v686_v24, %v688_v25  ;;  %v694_v27 = vsel %vm689_vm14, %v688_v25, 0 }
 0x3cb   : > { %v723_v28 = vsel %vm367_vm11, %v694_v27, 0  ;;  %2313 = vmatprep.subr.msk.bf16.mxu0 %vm367_vm11, %v691_v26 }
 0x3cc   : > { %2429 = vmatpush3.bf16.msra.mxu1 %v723_v28  ;;  %v672_v29 = vpop.permute.xlu0 %671 }
 0x3cd   : > { %v684_v30 = vpop.permute.xlu1 %683  ;;  %2430 = vmatprep.subr.bf16.mxu1 %v2885_v20  ;;  %v682_v34 = vsel %vm677_vm15, 0, %v672_v29 }
 0x3ce   : > { %v690_v31 = vsel %vm689_vm14, %v684_v30, %v686_v24  ;;  %v699_v50 = vsel %vm367_vm11, %v682_v34, %v695_v44 }
 0x3cf   : > { %v718_v32 = vsel %vm367_vm11, %v690_v31, 0 }
 0x3d0   : > { %v676_v33 = vpop.permute.xlu0 %675  ;;  %738 = vmatpush1.bf16.msra.mxu0 %v718_v32 }
 0x3d1   : > { %v674_v35 = vpop.permute.xlu1 %673 }
 0x3d2   : > { %v678_v41 = vsel %vm677_vm15, %v672_v29, %v674_v35  ;;  %v679_v43 = vsel %vm677_vm15, %v674_v35, %v676_v33 }
 0x3d3   : > { %v703_v46 = vsel %vm367_vm11, %v678_v41, %v696_v38  ;;  %v707_v48 = vsel %vm367_vm11, %v679_v43, %v697_v40 }
 0x3d4   : > { %739 = vmatprep.subr.bf16.mxu0 %v703_v46  ;;  %2431 = vmatpush3.bf16.msra.mxu1 %v707_v48 }
 0x3d5   : > { %740 = vmatpush1.bf16.msra.mxu0 %v699_v50  ;;  %2436 = vmatprep.subr.bf16.mxu1 %v2885_v20 }
 0x3d7   : > { %2433 = vmatmul.mubr.msk.bf16.vlgmr.msra.gmra.mxu1 %vm384_vm13, %v3118_v6 }
 0x3d8   : > { %2314 = vmatmul.mubr.msk.bf16.vlgmr.msra.gmra.mxu0 %vm384_vm13, %v3118_v6  ;;  %2440 = vmatprep.mubr.msk.bf16.mxu1 %vm2886_vm9, %v2885_v20 }
 0x3d9   : > { %918 = vmatprep.mubr.bf16.mxu0 %v2887_v49 }
 0x3de   : > { %v712_v51 = vpop.permute.xlu1 %711 }
 0x497   : > { %v800_v52 = vpop.f32.mrf.mxu1 }
 0x498   : > { %v801_v53 = vadd.f32 %v800_v52, %v712_v51  ;;  %v759_v54 = vpop.f32.mrf.mxu0 }
 0x499   : > { %v760_v55 = vadd.f32 %v759_v54, %v712_v51  ;;  %v2434_v56 = vpop.f32.mrf.mxu1 }
 0x49a   : > { %v2318_v57 = vmul.f32 -1.442695, %v801_v53  ;;  %v761_v58 = vpop.f32.mrf.mxu0 }
 0x49b   : > { %v2316_v59 = vmul.f32 -1.442695, %v760_v55  ;;  %v762_v60 = vadd.f32 %v761_v58, %v712_v51  ;;  %v803_v61 = vpop.f32.mrf.mxu1 }
 0x49c   : > { %2626 = vpow2.f32 %v2318_v57  ;;  %v763_v62 = vpop.f32.mrf.mxu0 }
 0x49d   : > { %2628 = vpow2.f32 %v2316_v59  ;;  %v2317_v63 = vmul.f32 -1.442695, %v762_v60  ;;  %v2435_v0 = vpop.f32.mrf.mxu1 }
 0x49e   : > { %v764_v1 = vpop.f32.mrf.mxu0 }
 0x49f   : > { %2630 = vpow2.f32 %v2317_v63 }
 0x4a9   : > { %v2627_v17 = vpop.eup %2626 }
 0x4aa   : > { %v2629_v18 = vpop.eup %2628  ;;  %v817_v19 = vadd.f32 1.0, %v2627_v17 }
 0x4ab   : > { %v815_v21 = vadd.f32 1.0, %v2629_v18 }
 0x4ac   : > { %v2631_v22 = vpop.eup %2630  ;;  %2632 = vrcp.f32 %v817_v19 }
 0x4ad   : > { %2634 = vrcp.f32 %v815_v21  ;;  %v816_v23 = vadd.f32 1.0, %v2631_v22 }
 0x4af   : > { %2636 = vrcp.f32 %v816_v23 }
 0x4b9   : > { %v2633_v24 = vpop.eup %2632 }
 0x4ba   : > { %v2635_v25 = vpop.eup %2634  ;;  %v826_v26 = vmul.f32 %v2633_v24, %v801_v53 }
 0x4bb   : > { %v824_v27 = vmul.f32 %v2635_v25, %v760_v55 }
 0x4bc   : > { %v2637_v28 = vpop.eup %2636  ;;  %v829_v29 = vmul.f32 %v3183_v39, %v826_v26 }
 0x4bd   : > { %v825_v30 = vmul.f32 %v2637_v28, %v762_v60  ;;  %v827_v32 = vmul.f32 %v3179_v36, %v824_v27 }
 0x4be   : > { %v832_v31 = vpack.c.bf16 %v829_v29, %v829_v29 }
 0x4bf   : > { %v828_v33 = vmul.f32 %v3187_v42, %v825_v30  ;;  %v830_v35 = vpack.c.bf16 %v827_v32, %v827_v32 }
 0x4c0   : > { %850 = vrot.lane.b32.xlu0 %v832_v31, %s2888_s14  ;;  %v858_v60 = vrot.slane %v832_v31, 4 }
 0x4c1   : > { %v831_v34 = vpack.c.bf16 %v828_v33, %v828_v33  ;;  %v856_v56 = vrot.slane %v830_v35, 4 }
 0x4c3   : > { %848 = vrot.lane.b32.xlu1 %v831_v34, %s2888_s14  ;;  %v857_v54 = vrot.slane %v831_v34, 4 }
 0x4c4   : > { %846 = vrot.lane.b32.xlu0 %v830_v35, %s2888_s14 }
 0x4c7   : > { %836 = vrot.lane.b32.xlu1 %v830_v35, %s2889_s9 }
 0x4c8   : > { %838 = vrot.lane.b32.xlu0 %v831_v34, %s2889_s9 }
 0x4cb   : > { %840 = vrot.lane.b32.xlu1 %v832_v31, %s2889_s9 }
 0x4cc   : > { %872 = vperm.xlu0 %2588, %v3163_v15  }
 0x532   : > { %v851_v38 = vpop.permute.xlu0 %850 }
 0x533   : > { %v855_v40 = vsel %vm358_vm10, %v851_v38, 0 }
 0x534   : > { %v884_v41 = vsel %vm367_vm11, %v855_v40, 0 }
 0x535   : > { %2437 = vmatpush3.bf16.msra.mxu1 %v884_v41  ;;  %v849_v43 = vpop.permute.xlu1 %848 }
 0x536   : > { %v853_v44 = vsel %vm358_vm10, %v849_v43, %v851_v38  ;;  %v847_v46 = vpop.permute.xlu0 %846  ;;  %2438 = vmatprep.subr.bf16.mxu1 %v2885_v20 }
 0x537   : > { %v852_v48 = vsel %vm358_vm10, %v847_v46, %v849_v43  ;;  %2319 = vmatprep.subr.msk.bf16.mxu0 %vm367_vm11, %v853_v44 }
 0x538   : > { %v879_v50 = vsel %vm367_vm11, %v852_v48, 0 }
 0x539   : > { %v837_v51 = vpop.permute.xlu1 %836  ;;  %899 = vmatpush1.bf16.msra.mxu0 %v879_v50 }
 0x53a   : > { %v845_v52 = vsel %vm345_vm12, 0, %v837_v51  ;;  %v839_v53 = vpop.permute.xlu0 %838 }
 0x53b   : > { %v842_v55 = vsel %vm345_vm12, %v837_v51, %v839_v53  ;;  %v860_v59 = vsel %vm367_vm11, %v845_v52, %v856_v56 }
 0x53c   : > { %v864_v57 = vsel %vm367_vm11, %v842_v55, %v857_v54 }
 0x53d   : > { %v841_v58 = vpop.permute.xlu1 %840  ;;  %900 = vmatprep.subr.bf16.mxu0 %v864_v57 }
 0x53e   : > { %v843_v61 = vsel %vm345_vm12, %v839_v53, %v841_v58  ;;  %901 = vmatpush1.bf16.msra.mxu0 %v860_v59 }
 0x53f   : > { %v868_v62 = vsel %vm367_vm11, %v843_v61, %v858_v60 }
 0x540   : > { %2439 = vmatpush3.bf16.msra.mxu1 %v868_v62 }
 0x541   : > { %2320 = vmatmul.mubr.msk.bf16.vlgmr.msra.gmra.mxu0 %vm384_vm13, %v3133_v9  ;;  %2444 = vmatprep.subr.bf16.mxu1 %v2885_v20 }
 0x542   : > { %1086 = vmatprep.mubr.bf16.mxu0 %v2887_v49 }
 0x543   : > { %2441 = vmatmul.mubr.msk.bf16.vlgmr.msra.gmra.mxu1 %vm384_vm13, %v3133_v9 }
 0x544   : > { %2448 = vmatprep.mubr.msk.bf16.mxu1 %vm2886_vm9, %v2885_v20 }
 0x547   : > { %v873_v63 = vpop.permute.xlu0 %872 }
 0x601   : > { %v920_v0 = vpop.f32.mrf.mxu0 }
 0x602   : > { %v921_v1 = vadd.f32 %v920_v0, %v873_v63 }
 0x603   : > { %v922_v17 = vpop.f32.mrf.mxu0  ;;  %v961_v18 = vpop.f32.mrf.mxu1 }
 0x604   : > { %v967_v19 = vadd.f32 %v921_v1, %v3258_v37  ;;  %v923_v21 = vadd.f32 %v922_v17, %v873_v63  ;;  %v962_v22 = vadd.f32 %v961_v18, %v873_v63 }
 0x605   : > { %v924_v23 = vpop.f32.mrf.mxu0  ;;  %v2442_v24 = vpop.f32.mrf.mxu1 }
 0x606   : > { %v2322_v25 = vmul.f32 -1.442695, %v967_v19  ;;  %v3324_v26 = vadd.f32 %v923_v21, %v3262_v45  ;;  %v969_v27 = vadd.f32 %v962_v22, %v3265_v47 }
 0x607   : > { %v925_v28 = vpop.f32.mrf.mxu0  ;;  %v964_v29 = vpop.f32.mrf.mxu1 }
 0x608   : > { %2638 = vpow2.f32 %v2322_v25  ;;  %v2323_v30 = vmul.f32 -1.442695, %v3324_v26  ;;  %v2324_v31 = vmul.f32 -1.442695, %v969_v27 }
 0x609   : > { %v2443_v32 = vpop.f32.mrf.mxu1 }
 0x60a   : > { %2640 = vpow2.f32 %v2323_v30 }
 0x60b   : > { %2642 = vpow2.f32 %v2324_v31 }
 0x615   : > { %v2639_v37 = vpop.eup %2638 }
 0x616   : > { %v979_v33 = vadd.f32 1.0, %v2639_v37 }
 0x617   : > { %v2641_v34 = vpop.eup %2640 }
 0x618   : > { %v2643_v35 = vpop.eup %2642  ;;  %2644 = vrcp.f32 %v979_v33  ;;  %v980_v38 = vadd.f32 1.0, %v2641_v34 }
 0x619   : > { %v981_v40 = vadd.f32 1.0, %v2643_v35 }
 0x61a   : > { %2646 = vrcp.f32 %v980_v38 }
 0x61b   : > { %2648 = vrcp.f32 %v981_v40 }
 0x625   : > { %v2645_v45 = vpop.eup %2644 }
 0x626   : > { %v988_v43 = vmul.f32 %v2645_v45, %v967_v19 }
 0x627   : > { %v2647_v47 = vpop.eup %2646 }
 0x628   : > { %v2649_v41 = vpop.eup %2648  ;;  %v989_v44 = vmul.f32 %v2647_v47, %v3324_v26  ;;  %v991_v52 = vmul.f32 %v3179_v36, %v988_v43 }
 0x629   : > { %v990_v46 = vmul.f32 %v2649_v41, %v969_v27 }
 0x62a   : > { %v992_v48 = vmul.f32 %v3187_v42, %v989_v44  ;;  %v994_v54 = vpack.c.bf16 %v991_v52, %v991_v52 }
 0x62b   : > { %v993_v50 = vmul.f32 %v3183_v39, %v990_v46 }
 0x62c   : > { %v995_v51 = vpack.c.bf16 %v992_v48, %v992_v48  ;;  %v1024_v23 = vrot.slane %v994_v54, 4 }
 0x62d   : > { %v996_v53 = vpack.c.bf16 %v993_v50, %v993_v50 }
 0x62e   : > { %1014 = vrot.lane.b32.xlu0 %v995_v51, %s2892_s23  ;;  %v1025_v18 = vrot.slane %v995_v51, 4 }
 0x62f   : > { %1016 = vrot.lane.b32.xlu1 %v996_v53, %s2892_s23  ;;  %v1026_v19 = vrot.slane %v996_v53, 4 }
 0x632   : > { %1000 = vrot.lane.b32.xlu0 %v994_v54, %s2893_s24 }
 0x633   : > { %1012 = vrot.lane.b32.xlu1 %v994_v54, %s2892_s23 }
 0x636   : > { %1004 = vrot.lane.b32.xlu0 %v996_v53, %s2893_s24 }
 0x637   : > { %1002 = vrot.lane.b32.xlu1 %v995_v51, %s2893_s24 }
 0x63b   : > { %1040 = vperm.xlu1 %2589, %v3153_v13  }
 0x6a0   : > { %v1015_v55 = vpop.permute.xlu0 %1014 }
 0x6a1   : > { %v1017_v56 = vpop.permute.xlu1 %1016 }
 0x6a2   : > { %v1023_v57 = vsel %vm1018_vm0, %v1017_v56, 0  ;;  %v1020_v58 = vsel %vm1018_vm0, %v1015_v55, %v1017_v56 }
 0x6a3   : > { %v1052_v59 = vsel %vm367_vm11, %v1023_v57, 0  ;;  %2325 = vmatprep.subr.msk.bf16.mxu0 %vm367_vm11, %v1020_v58 }
 0x6a4   : > { %2445 = vmatpush3.bf16.msra.mxu1 %v1052_v59  ;;  %v1001_v60 = vpop.permute.xlu0 %1000 }
 0x6a5   : > { %v1013_v61 = vpop.permute.xlu1 %1012  ;;  %2446 = vmatprep.subr.bf16.mxu1 %v2885_v20  ;;  %v1011_v1 = vsel %vm1006_vm1, 0, %v1001_v60 }
 0x6a6   : > { %v1019_v62 = vsel %vm1018_vm0, %v1013_v61, %v1015_v55  ;;  %v1028_v20 = vsel %vm367_vm11, %v1011_v1, %v1024_v23 }
 0x6a7   : > { %v1047_v63 = vsel %vm367_vm11, %v1019_v62, 0 }
 0x6a8   : > { %1067 = vmatpush1.bf16.msra.mxu0 %v1047_v63  ;;  %v1005_v0 = vpop.permute.xlu0 %1004 }
 0x6a9   : > { %v1003_v17 = vpop.permute.xlu1 %1002 }
 0x6aa   : > { %v1007_v21 = vsel %vm1006_vm1, %v1001_v60, %v1003_v17  ;;  %v1008_v22 = vsel %vm1006_vm1, %v1003_v17, %v1005_v0 }
 0x6ab   : > { %v1032_v24 = vsel %vm367_vm11, %v1007_v21, %v1025_v18  ;;  %v1036_v25 = vsel %vm367_vm11, %v1008_v22, %v1026_v19 }
 0x6ac   : > { %1068 = vmatprep.subr.bf16.mxu0 %v1032_v24  ;;  %2447 = vmatpush3.bf16.msra.mxu1 %v1036_v25 }
 0x6ad   : > { %1069 = vmatpush1.bf16.msra.mxu0 %v1028_v20 }
 0x6af   : > { %2449 = vmatmul.mubr.msk.bf16.vlgmr.msra.gmra.mxu1 %vm384_vm13, %v3123_v7 }
 0x6b0   : > { %2326 = vmatmul.mubr.msk.bf16.vlgmr.msra.gmra.mxu0 %vm384_vm13, %v3123_v7 }
 0x6b1   : > { %1235 = vmatprep.mubr.bf16.mxu0 %v2887_v49 }
 0x6b6   : > { %v1041_v27 = vpop.permute.xlu1 %1040 }
 0x76f   : > { %v1129_v28 = vpop.f32.mrf.mxu1 }
 0x770   : > { %v1130_v29 = vadd.f32 %v1129_v28, %v1041_v27  ;;  %v1088_v30 = vpop.f32.mrf.mxu0 }
 0x771   : > { %v1089_v31 = vadd.f32 %v1088_v30, %v1041_v27  ;;  %v2450_v32 = vpop.f32.mrf.mxu1 }
 0x772   : > { %v2330_v37 = vmul.f32 -1.442695, %v1130_v29  ;;  %v1090_v33 = vpop.f32.mrf.mxu0 }
 0x773   : > { %v2328_v34 = vmul.f32 -1.442695, %v1089_v31  ;;  %v1091_v35 = vadd.f32 %v1090_v33, %v1041_v27  ;;  %v1132_v38 = vpop.f32.mrf.mxu1 }
 0x774   : > { %2650 = vpow2.f32 %v2330_v37  ;;  %v1092_v40 = vpop.f32.mrf.mxu0 }
 0x775   : > { %2652 = vpow2.f32 %v2328_v34  ;;  %v2329_v45 = vmul.f32 -1.442695, %v1091_v35  ;;  %v2451_v47 = vpop.f32.mrf.mxu1 }
 0x776   : > { %v1093_v41 = vpop.f32.mrf.mxu0 }
 0x777   : > { %2654 = vpow2.f32 %v2329_v45 }
 0x781   : > { %v2651_v43 = vpop.eup %2650 }
 0x782   : > { %v2653_v49 = vpop.eup %2652  ;;  %v1146_v44 = vadd.f32 1.0, %v2651_v43 }
 0x783   : > { %v1144_v46 = vadd.f32 1.0, %v2653_v49 }
 0x784   : > { %v2655_v48 = vpop.eup %2654  ;;  %2656 = vrcp.f32 %v1146_v44 }
 0x785   : > { %2658 = vrcp.f32 %v1144_v46  ;;  %v1145_v50 = vadd.f32 1.0, %v2655_v48 }
 0x787   : > { %2660 = vrcp.f32 %v1145_v50 }
 0x791   : > { %v2657_v51 = vpop.eup %2656 }
 0x792   : > { %v2659_v52 = vpop.eup %2658  ;;  %v1155_v53 = vmul.f32 %v2657_v51, %v1130_v29 }
 0x793   : > { %v1153_v54 = vmul.f32 %v2659_v52, %v1089_v31 }
 0x794   : > { %v2661_v55 = vpop.eup %2660  ;;  %v1158_v56 = vmul.f32 %v3183_v39, %v1155_v53 }
 0x795   : > { %v1154_v57 = vmul.f32 %v2661_v55, %v1091_v35  ;;  %v1156_v59 = vmul.f32 %v3179_v36, %v1153_v54 }
 0x796   : > { %v1161_v58 = vpack.c.bf16 %v1158_v56, %v1158_v56 }
 0x797   : > { %v1157_v60 = vmul.f32 %v3187_v42, %v1154_v57  ;;  %v1159_v62 = vpack.c.bf16 %v1156_v59, %v1156_v59 }
 0x798   : > { %1176 = vrot.lane.b32.xlu0 %v1161_v58, %s2888_s14 }
 0x799   : > { %v1160_v61 = vpack.c.bf16 %v1157_v60, %v1157_v60  ;;  %v1180_v23 = vrot.slane %v1159_v62, 4 }
 0x79b   : > { %1174 = vrot.lane.b32.xlu1 %v1160_v61, %s2888_s14  ;;  %v1181_v21 = vrot.slane %v1160_v61, 4 }
 0x79c   : > { %1172 = vrot.lane.b32.xlu0 %v1159_v62, %s2888_s14 }
 0x79f   : > { %1164 = vrot.lane.b32.xlu1 %v1159_v62, %s2889_s9 }
 0x7a0   : > { %1166 = vrot.lane.b32.xlu0 %v1160_v61, %s2889_s9 }
 0x7a3   : > { %1191 = vperm.xlu1 %2589, %v3168_v16  }
 0x80a   : > { %v1177_v39 = vpop.permute.xlu0 %1176 }
 0x80d   : > { %v1175_v63 = vpop.permute.xlu1 %1174 }
 0x80e   : > { %v1179_v36 = vsel %vm358_vm10, %v1175_v63, %v1177_v39  ;;  %v1173_v0 = vpop.permute.xlu0 %1172 }
 0x80f   : > { %v1178_v42 = vsel %vm358_vm10, %v1173_v0, %v1175_v63  ;;  %2331 = vmatprep.subr.msk.bf16.mxu0 %vm367_vm11, %v1179_v36 }
 0x810   : > { %v1198_v1 = vsel %vm367_vm11, %v1178_v42, 0 }
 0x811   : > { %v1165_v17 = vpop.permute.xlu1 %1164  ;;  %1216 = vmatpush1.bf16.msra.mxu0 %v1198_v1 }
 0x812   : > { %v1170_v18 = vsel %vm345_vm12, 0, %v1165_v17  ;;  %v1167_v19 = vpop.permute.xlu0 %1166 }
 0x813   : > { %v1168_v22 = vsel %vm345_vm12, %v1165_v17, %v1167_v19  ;;  %v1183_v25 = vsel %vm367_vm11, %v1170_v18, %v1180_v23 }
 0x814   : > { %v1187_v24 = vsel %vm367_vm11, %v1168_v22, %v1181_v21 }
 0x815   : > { %1217 = vmatprep.subr.bf16.mxu0 %v1187_v24 }
 0x816   : > { %1218 = vmatpush1.bf16.msra.mxu0 %v1183_v25 }
 0x819   : > { %2332 = vmatmul.mubr.msk.bf16.vlgmr.msra.gmra.mxu0 %vm384_vm13, %v3138_v10 }
 0x81e   : > { %v1192_v27 = vpop.permute.xlu1 %1191 }
 0x8d9   : > { %v1237_v20 = vpop.f32.mrf.mxu0 }
 0x8db   : > { %v1238_v28 = vpop.f32.mrf.mxu0 }
 0x8dc   : > { %v1239_v29 = vadd.f32 %v1238_v28, %v1192_v27 }
 0x8dd   : > { %v1240_v30 = vpop.f32.mrf.mxu0 }
 0x8de   : > { %v1243_v31 = vadd.f32 %v1239_v29, %v3324_v26 }
 0x8df   : > { %v1241_v32 = vpop.f32.mrf.mxu0 }
 0x8e0   : > { %1244 = vst [vmem:[%s3091_s20] sm:$0xff] %v1243_v31 }
 0x8e1 PF: > { %1247 = sbr.rel (%p3098_p10) target bundleno = 4452 (0x1164), region = 60  ;;  %s2895_s13 = smov (!%p3098_p10), 127  }
 0x8e2   : > { %s2898_s16 = smov (!%p3098_p10), 1   ;;  %s2899_s15 = smov (!%p3098_p10), 125  }
 0x8e3   : > { %s2900_s30 = smov (!%p3098_p10), 3   ;;  %s2901_s10 = smov (!%p3098_p10), 123  }
 0x8e4   : > { %s2902_s11 = smov (!%p3098_p10), 5  }
 0x8e6   : > { %v2335_v37 = vmul.f32 -1.442695, %v3113_v5  ;;  %v2333_v33 = vmul.f32 -1.442695, %v3109_v3  ;;  %v2334_v34 = vmul.f32 -1.442695, %v3111_v4 }
 0x8e7   : > { %v2894_v41 = vmov 0.0   ;;  %vm2896_vm2 = vmmov 0   ;;  %v2897_v54 = vmov 0   ;;  %vm1294_vm3 = vcmask 1039360  }
 0x8e8   : > { %2664 = vpow2.f32 %v2335_v37  ;;  %2452 = vmatprep.subr.bf16.mxu1 %v2894_v41  ;;  %2456 = vmatprep.mubr.msk.bf16.mxu1 %vm2896_vm2, %v2894_v41  ;;  %vm1303_vm4 = vcmask 1043456   ;;  %vm1281_vm5 = vcmask 7168   ;;  %vm1320_vm6 = vcmask 195584  }
 0x8e9   : > { %2666 = vpow2.f32 %v2333_v33  ;;  %1364 = vmatprep.mubr.bf16.mxu0 %v2897_v54  ;;  %2662 = vset.pattern.permute.xlu0 %v2897_v54  ;;  %vm1619_vm7 = vcmask 1022976   ;;  %vm1607_vm8 = vcmask 23552   ;;  %vm1942_vm9 = vcmask 1006592  }
 0x8ea   : > { %2668 = vpow2.f32 %v2334_v34  ;;  %2663 = vset.pattern.permute.xlu1 %v2897_v54  ;;  %vm1930_vm10 = vcmask 39936  }
 0x8f5   : > { %v2665_v35 = vpop.eup %2664 }
 0x8f6   : > { %v2667_v38 = vpop.eup %2666  ;;  %v1259_v40 = vadd.f32 1.0, %v2665_v35 }
 0x8f7   : > { %v2669_v45 = vpop.eup %2668  ;;  %v1257_v26 = vadd.f32 1.0, %v2667_v38 }
 0x8f8   : > { %2670 = vrcp.f32 %v1259_v40  ;;  %v1258_v47 = vadd.f32 1.0, %v2669_v45 }
 0x8f9   : > { %2672 = vrcp.f32 %v1257_v26 }
 0x8fa   : > { %2674 = vrcp.f32 %v1258_v47 }
 0x905   : > { %v2671_v43 = vpop.eup %2670 }
 0x906   : > { %v2673_v49 = vpop.eup %2672  ;;  %v1268_v44 = vmul.f32 %v2671_v43, %v3113_v5 }
 0x907   : > { %v2675_v46 = vpop.eup %2674  ;;  %v1266_v48 = vmul.f32 %v2673_v49, %v3109_v3 }
 0x908   : > { %v1271_v50 = vpack.c.bf16 %v1268_v44, %v1268_v44  ;;  %v1267_v51 = vmul.f32 %v2675_v46, %v3111_v4 }
 0x909   : > { %v1269_v52 = vpack.c.bf16 %v1266_v48, %v1266_v48 }
 0x90a   : > { %1292 = vrot.lane.b32.xlu1 %v1271_v50, %s2895_s13  ;;  %v1270_v53 = vpack.c.bf16 %v1267_v51, %v1267_v51  ;;  %v1302_v0 = vrot.slane %v1271_v50, 4 }
 0x90b   : > { %1288 = vrot.lane.b32.xlu0 %v1269_v52, %s2895_s13  ;;  %v1300_v39 = vrot.slane %v1269_v52, 4 }
 0x90c   : > { %v1301_v36 = vrot.slane %v1270_v53, 4 }
 0x90e   : > { %1275 = vrot.lane.b32.xlu1 %v1269_v52, %s2898_s16 }
 0x90f   : > { %1290 = vrot.lane.b32.xlu0 %v1270_v53, %s2895_s13 }
 0x912   : > { %1279 = vrot.lane.b32.xlu1 %v1271_v50, %s2898_s16 }
 0x913   : > { %1277 = vrot.lane.b32.xlu0 %v1270_v53, %s2898_s16 }
 0x917   : > { %1317 = vperm.xlu0 %2662, %v3143_v11  }
 0x97c   : > { %v1293_v55 = vpop.permute.xlu1 %1292 }
 0x97d   : > { %v1289_v56 = vpop.permute.xlu0 %1288  ;;  %v1299_v57 = vsel %vm1294_vm3, %v1293_v55, 0 }
 0x97e   : > { %v1330_v58 = vsel %vm1303_vm4, %v1299_v57, 0 }
 0x97f   : > { %2453 = vmatpush3.bf16.msra.mxu1 %v1330_v58 }
 0x980   : > { %v1276_v59 = vpop.permute.xlu1 %1275  ;;  %2454 = vmatprep.subr.bf16.mxu1 %v2894_v41 }
 0x981   : > { %v1291_v60 = vpop.permute.xlu0 %1290  ;;  %v1287_v11 = vsel %vm1281_vm5, 0, %v1276_v59 }
 0x982   : > { %v1296_v61 = vsel %vm1294_vm3, %v1291_v60, %v1293_v55  ;;  %v1295_v62 = vsel %vm1294_vm3, %v1289_v56, %v1291_v60  ;;  %v1305_v19 = vsel %vm1303_vm4, %v1287_v11, %v1300_v39 }
 0x983   : > { %2336 = vmatprep.subr.msk.bf16.mxu0 %vm1303_vm4, %v1296_v61  ;;  %v1325_v63 = vsel %vm1303_vm4, %v1295_v62, 0 }
 0x984   : > { %1345 = vmatpush1.bf16.msra.mxu0 %v1325_v63  ;;  %v1280_v42 = vpop.permute.xlu1 %1279 }
 0x985   : > { %v1278_v1 = vpop.permute.xlu0 %1277 }
 0x986   : > { %v1282_v17 = vsel %vm1281_vm5, %v1276_v59, %v1278_v1  ;;  %v1283_v18 = vsel %vm1281_vm5, %v1278_v1, %v1280_v42 }
 0x987   : > { %v1309_v21 = vsel %vm1303_vm4, %v1282_v17, %v1301_v36  ;;  %v1313_v22 = vsel %vm1303_vm4, %v1283_v18, %v1302_v0 }
 0x988   : > { %1346 = vmatprep.subr.bf16.mxu0 %v1309_v21  ;;  %2455 = vmatpush3.bf16.msra.mxu1 %v1313_v22 }
 0x989   : > { %1347 = vmatpush1.bf16.msra.mxu0 %v1305_v19  ;;  %2460 = vmatprep.subr.bf16.mxu1 %v2894_v41 }
 0x98b   : > { %2457 = vmatmul.mubr.msk.bf16.vlgmr.msra.gmra.mxu1 %vm1320_vm6, %v3107_v2 }
 0x98c   : > { %2337 = vmatmul.mubr.msk.bf16.vlgmr.msra.gmra.mxu0 %vm1320_vm6, %v3107_v2  ;;  %2464 = vmatprep.mubr.msk.bf16.mxu1 %vm2896_vm2, %v2894_v41 }
 0x98d   : > { %1522 = vmatprep.mubr.bf16.mxu0 %v2897_v54 }
 0x992   : > { %v1318_v23 = vpop.permute.xlu0 %1317 }
 0xa4b   : > { %v1407_v24 = vpop.f32.mrf.mxu1 }
 0xa4c   : > { %v1408_v25 = vadd.f32 %v1407_v24, %v1318_v23  ;;  %v1366_v20 = vpop.f32.mrf.mxu0 }
 0xa4d   : > { %v1367_v27 = vadd.f32 %v1366_v20, %v1318_v23  ;;  %v2458_v28 = vpop.f32.mrf.mxu1 }
 0xa4e   : > { %v2341_v29 = vmul.f32 -1.442695, %v1408_v25  ;;  %v1368_v30 = vpop.f32.mrf.mxu0 }
 0xa4f   : > { %v2339_v31 = vmul.f32 -1.442695, %v1367_v27  ;;  %v1369_v32 = vadd.f32 %v1368_v30, %v1318_v23  ;;  %v1410_v37 = vpop.f32.mrf.mxu1 }
 0xa50   : > { %2676 = vpow2.f32 %v2341_v29  ;;  %v1370_v33 = vpop.f32.mrf.mxu0 }
 0xa51   : > { %2678 = vpow2.f32 %v2339_v31  ;;  %v2340_v2 = vmul.f32 -1.442695, %v1369_v32  ;;  %v2459_v34 = vpop.f32.mrf.mxu1 }
 0xa52   : > { %v1371_v35 = vpop.f32.mrf.mxu0 }
 0xa53   : > { %2680 = vpow2.f32 %v2340_v2 }
 0xa5d   : > { %v2677_v38 = vpop.eup %2676 }
 0xa5e   : > { %v2679_v40 = vpop.eup %2678  ;;  %v1424_v45 = vadd.f32 1.0, %v2677_v38 }
 0xa5f   : > { %v1422_v26 = vadd.f32 1.0, %v2679_v40 }
 0xa60   : > { %v2681_v47 = vpop.eup %2680  ;;  %2682 = vrcp.f32 %v1424_v45 }
 0xa61   : > { %2684 = vrcp.f32 %v1422_v26  ;;  %v1423_v43 = vadd.f32 1.0, %v2681_v47 }
 0xa63   : > { %2686 = vrcp.f32 %v1423_v43 }
 0xa6d   : > { %v2683_v49 = vpop.eup %2682 }
 0xa6e   : > { %v2685_v44 = vpop.eup %2684  ;;  %v1433_v46 = vmul.f32 %v2683_v49, %v1408_v25 }
 0xa6f   : > { %v1431_v48 = vmul.f32 %v2685_v44, %v1367_v27 }
 0xa70   : > { %v2687_v50 = vpop.eup %2686  ;;  %v1436_v51 = vpack.c.bf16 %v1433_v46, %v1433_v46 }
 0xa71   : > { %v1434_v52 = vpack.c.bf16 %v1431_v48, %v1431_v48  ;;  %v1432_v53 = vmul.f32 %v2687_v50, %v1369_v32 }
 0xa72   : > { %1454 = vrot.lane.b32.xlu0 %v1436_v51, %s2895_s13  ;;  %v1462_v19 = vrot.slane %v1436_v51, 4 }
 0xa73   : > { %v1435_v55 = vpack.c.bf16 %v1432_v53, %v1432_v53  ;;  %1450 = vrot.lane.b32.xlu1 %v1434_v52, %s2895_s13  ;;  %v1460_v39 = vrot.slane %v1434_v52, 4 }
 0xa75   : > { %v1461_v36 = vrot.slane %v1435_v55, 4 }
 0xa76   : > { %1442 = vrot.lane.b32.xlu0 %v1435_v55, %s2898_s16 }
 0xa77   : > { %1452 = vrot.lane.b32.xlu1 %v1435_v55, %s2895_s13 }
 0xa7a   : > { %1476 = vperm.xlu0 %2662, %v3158_v14  }
 0xa7b   : > { %1440 = vrot.lane.b32.xlu1 %v1434_v52, %s2898_s16 }
 0xa7f   : > { %1444 = vrot.lane.b32.xlu1 %v1436_v51, %s2898_s16 }
 0xae4   : > { %v1455_v56 = vpop.permute.xlu0 %1454 }
 0xae5   : > { %v1459_v57 = vsel %vm1294_vm3, %v1455_v56, 0  ;;  %v1451_v58 = vpop.permute.xlu1 %1450 }
 0xae6   : > { %v1488_v59 = vsel %vm1303_vm4, %v1459_v57, 0 }
 0xae7   : > { %2461 = vmatpush3.bf16.msra.mxu1 %v1488_v59 }
 0xae8   : > { %2462 = vmatprep.subr.bf16.mxu1 %v2894_v41  ;;  %v1443_v11 = vpop.permute.xlu0 %1442 }
 0xae9   : > { %v1453_v60 = vpop.permute.xlu1 %1452 }
 0xaea   : > { %v1456_v61 = vsel %vm1294_vm3, %v1451_v58, %v1453_v60  ;;  %v1457_v62 = vsel %vm1294_vm3, %v1453_v60, %v1455_v56 }
 0xaeb   : > { %v1483_v14 = vsel %vm1303_vm4, %v1456_v61, 0  ;;  %2342 = vmatprep.subr.msk.bf16.mxu0 %vm1303_vm4, %v1457_v62 }
 0xaec   : > { %1503 = vmatpush1.bf16.msra.mxu0 %v1483_v14 }
 0xaed   : > { %v1441_v63 = vpop.permute.xlu1 %1440 }
 0xaee   : > { %v1446_v0 = vsel %vm1281_vm5, %v1441_v63, %v1443_v11  ;;  %v1449_v42 = vsel %vm1281_vm5, 0, %v1441_v63 }
 0xaef   : > { %v1468_v1 = vsel %vm1303_vm4, %v1446_v0, %v1461_v36  ;;  %v1464_v17 = vsel %vm1303_vm4, %v1449_v42, %v1460_v39 }
 0xaf0   : > { %1504 = vmatprep.subr.bf16.mxu0 %v1468_v1 }
 0xaf1   : > { %v1445_v18 = vpop.permute.xlu1 %1444  ;;  %1505 = vmatpush1.bf16.msra.mxu0 %v1464_v17 }
 0xaf2   : > { %v1447_v21 = vsel %vm1281_vm5, %v1443_v11, %v1445_v18 }
 0xaf3   : > { %v1472_v22 = vsel %vm1303_vm4, %v1447_v21, %v1462_v19 }
 0xaf4   : > { %2343 = vmatmul.mubr.msk.bf16.vlgmr.msra.gmra.mxu0 %vm1320_vm6, %v3128_v8  ;;  %2463 = vmatpush3.bf16.msra.mxu1 %v1472_v22 }
 0xaf5   : > { %2468 = vmatprep.subr.bf16.mxu1 %v2894_v41  ;;  %1687 = vmatprep.mubr.bf16.mxu0 %v2897_v54  ;;  %v1477_v23 = vpop.permute.xlu0 %1476 }
 0xaf7   : > { %2465 = vmatmul.mubr.msk.bf16.vlgmr.msra.gmra.mxu1 %vm1320_vm6, %v3128_v8 }
 0xaf8   : > { %2472 = vmatprep.mubr.msk.bf16.mxu1 %vm2896_vm2, %v2894_v41 }
 0xbb4   : > { %v1524_v24 = vpop.f32.mrf.mxu0 }
 0xbb5   : > { %v1525_v25 = vadd.f32 %v1524_v24, %v1477_v23 }
 0xbb6   : > { %v1526_v20 = vpop.f32.mrf.mxu0 }
 0xbb7   : > { %v3437_v27 = vadd.f32 %v1525_v25, %v3109_v3  ;;  %v1527_v28 = vadd.f32 %v1526_v20, %v1477_v23  ;;  %v1565_v29 = vpop.f32.mrf.mxu1 }
 0xbb8   : > { %v1566_v30 = vadd.f32 %v1565_v29, %v1477_v23  ;;  %v1528_v31 = vpop.f32.mrf.mxu0 }
 0xbb9   : > { %v2345_v32 = vmul.f32 -1.442695, %v3437_v27  ;;  %v3441_v37 = vadd.f32 %v1527_v28, %v3111_v4  ;;  %v2466_v8 = vpop.f32.mrf.mxu1 }
 0xbba   : > { %v3444_v33 = vadd.f32 %v1566_v30, %v3113_v5  ;;  %v1529_v2 = vpop.f32.mrf.mxu0 }
 0xbbb   : > { %2688 = vpow2.f32 %v2345_v32  ;;  %v2346_v34 = vmul.f32 -1.442695, %v3441_v37  ;;  %v1568_v35 = vpop.f32.mrf.mxu1 }
 0xbbc   : > { %v2347_v3 = vmul.f32 -1.442695, %v3444_v33 }
 0xbbd   : > { %2690 = vpow2.f32 %v2346_v34  ;;  %v2467_v38 = vpop.f32.mrf.mxu1 }
 0xbbe   : > { %2692 = vpow2.f32 %v2347_v3 }
 0xbc8   : > { %v2689_v40 = vpop.eup %2688 }
 0xbc9   : > { %v1583_v45 = vadd.f32 1.0, %v2689_v40 }
 0xbca   : > { %v2691_v26 = vpop.eup %2690 }
 0xbcb   : > { %v2693_v47 = vpop.eup %2692  ;;  %v1584_v4 = vadd.f32 1.0, %v2691_v26  ;;  %2694 = vrcp.f32 %v1583_v45 }
 0xbcc   : > { %v1585_v43 = vadd.f32 1.0, %v2693_v47 }
 0xbcd   : > { %2696 = vrcp.f32 %v1584_v4 }
 0xbce   : > { %2698 = vrcp.f32 %v1585_v43 }
 0xbd8   : > { %v2695_v5 = vpop.eup %2694 }
 0xbd9   : > { %v1592_v51 = vmul.f32 %v2695_v5, %v3437_v27 }
 0xbda   : > { %v2697_v49 = vpop.eup %2696 }
 0xbdb   : > { %v2699_v44 = vpop.eup %2698  ;;  %v1593_v46 = vmul.f32 %v2697_v49, %v3441_v37  ;;  %v1595_v53 = vpack.c.bf16 %v1592_v51, %v1592_v51 }
 0xbdc   : > { %v1594_v48 = vmul.f32 %v2699_v44, %v3444_v33 }
 0xbdd   : > { %v1596_v50 = vpack.c.bf16 %v1593_v46, %v1593_v46  ;;  %v1625_v1 = vrot.slane %v1595_v53, 4 }
 0xbde   : > { %v1597_v52 = vpack.c.bf16 %v1594_v48, %v1594_v48 }
 0xbdf   : > { %1615 = vrot.lane.b32.xlu0 %v1596_v50, %s2899_s15  ;;  %v1626_v63 = vrot.slane %v1596_v50, 4 }
 0xbe0   : > { %1617 = vrot.lane.b32.xlu1 %v1597_v52, %s2899_s15  ;;  %v1627_v36 = vrot.slane %v1597_v52, 4 }
 0xbe3   : > { %1601 = vrot.lane.b32.xlu0 %v1595_v53, %s2900_s30 }
 0xbe4   : > { %1613 = vrot.lane.b32.xlu1 %v1595_v53, %s2899_s15 }
 0xbe7   : > { %1605 = vrot.lane.b32.xlu0 %v1597_v52, %s2900_s30 }
 0xbe8   : > { %1603 = vrot.lane.b32.xlu1 %v1596_v50, %s2900_s30 }
 0xbec   : > { %1641 = vperm.xlu1 %2663, %v3148_v12  }
 0xc51   : > { %v1616_v55 = vpop.permute.xlu0 %1615 }
 0xc52   : > { %v1618_v56 = vpop.permute.xlu1 %1617 }
 0xc53   : > { %v1621_v57 = vsel %vm1619_vm7, %v1616_v55, %v1618_v56  ;;  %v1624_v58 = vsel %vm1619_vm7, %v1618_v56, 0 }
 0xc54   : > { %v1653_v59 = vsel %vm1303_vm4, %v1624_v58, 0  ;;  %2348 = vmatprep.subr.msk.bf16.mxu0 %vm1303_vm4, %v1621_v57 }
 0xc55   : > { %2469 = vmatpush3.bf16.msra.mxu1 %v1653_v59  ;;  %v1602_v60 = vpop.permute.xlu0 %1601 }
 0xc56   : > { %v1614_v61 = vpop.permute.xlu1 %1613  ;;  %2470 = vmatprep.subr.bf16.mxu1 %v2894_v41  ;;  %v1612_v12 = vsel %vm1607_vm8, 0, %v1602_v60 }
 0xc57   : > { %v1620_v62 = vsel %vm1619_vm7, %v1614_v61, %v1616_v55  ;;  %v1629_v19 = vsel %vm1303_vm4, %v1612_v12, %v1625_v1 }
 0xc58   : > { %v1648_v14 = vsel %vm1303_vm4, %v1620_v62, 0 }
 0xc59   : > { %v1606_v39 = vpop.permute.xlu0 %1605  ;;  %1668 = vmatpush1.bf16.msra.mxu0 %v1648_v14 }
 0xc5a   : > { %v1604_v11 = vpop.permute.xlu1 %1603 }
 0xc5b   : > { %v1608_v0 = vsel %vm1607_vm8, %v1602_v60, %v1604_v11  ;;  %v1609_v42 = vsel %vm1607_vm8, %v1604_v11, %v1606_v39 }
 0xc5c   : > { %v1633_v17 = vsel %vm1303_vm4, %v1608_v0, %v1626_v63  ;;  %v1637_v18 = vsel %vm1303_vm4, %v1609_v42, %v1627_v36 }
 0xc5d   : > { %1669 = vmatprep.subr.bf16.mxu0 %v1633_v17  ;;  %2471 = vmatpush3.bf16.msra.mxu1 %v1637_v18 }
 0xc5e   : > { %1670 = vmatpush1.bf16.msra.mxu0 %v1629_v19  ;;  %2476 = vmatprep.subr.bf16.mxu1 %v2894_v41 }
 0xc60   : > { %2473 = vmatmul.mubr.msk.bf16.vlgmr.msra.gmra.mxu1 %vm1320_vm6, %v3118_v6 }
 0xc61   : > { %2349 = vmatmul.mubr.msk.bf16.vlgmr.msra.gmra.mxu0 %vm1320_vm6, %v3118_v6  ;;  %2480 = vmatprep.mubr.msk.bf16.mxu1 %vm2896_vm2, %v2894_v41 }
 0xc62   : > { %1845 = vmatprep.mubr.bf16.mxu0 %v2897_v54 }
 0xc67   : > { %v1642_v21 = vpop.permute.xlu1 %1641 }
 0xd20   : > { %v1730_v22 = vpop.f32.mrf.mxu1 }
 0xd21   : > { %v1731_v23 = vadd.f32 %v1730_v22, %v1642_v21  ;;  %v1689_v24 = vpop.f32.mrf.mxu0 }
 0xd22   : > { %v1690_v25 = vadd.f32 %v1689_v24, %v1642_v21  ;;  %v2474_v20 = vpop.f32.mrf.mxu1 }
 0xd23   : > { %v2353_v28 = vmul.f32 -1.442695, %v1731_v23  ;;  %v1691_v29 = vpop.f32.mrf.mxu0 }
 0xd24   : > { %v2351_v30 = vmul.f32 -1.442695, %v1690_v25  ;;  %v1692_v31 = vadd.f32 %v1691_v29, %v1642_v21  ;;  %v1733_v32 = vpop.f32.mrf.mxu1 }
 0xd25   : > { %2700 = vpow2.f32 %v2353_v28  ;;  %v1693_v8 = vpop.f32.mrf.mxu0 }
 0xd26   : > { %2702 = vpow2.f32 %v2351_v30  ;;  %v2352_v6 = vmul.f32 -1.442695, %v1692_v31  ;;  %v2475_v2 = vpop.f32.mrf.mxu1 }
 0xd27   : > { %v1694_v34 = vpop.f32.mrf.mxu0 }
 0xd28   : > { %2704 = vpow2.f32 %v2352_v6 }
 0xd32   : > { %v2701_v35 = vpop.eup %2700 }
 0xd33   : > { %v2703_v3 = vpop.eup %2702  ;;  %v1747_v38 = vadd.f32 1.0, %v2701_v35 }
 0xd34   : > { %v1745_v40 = vadd.f32 1.0, %v2703_v3 }
 0xd35   : > { %v2705_v45 = vpop.eup %2704  ;;  %2706 = vrcp.f32 %v1747_v38 }
 0xd36   : > { %2708 = vrcp.f32 %v1745_v40  ;;  %v1746_v26 = vadd.f32 1.0, %v2705_v45 }
 0xd38   : > { %2710 = vrcp.f32 %v1746_v26 }
 0xd42   : > { %v2707_v47 = vpop.eup %2706 }
 0xd43   : > { %v2709_v4 = vpop.eup %2708  ;;  %v1756_v43 = vmul.f32 %v2707_v47, %v1731_v23 }
 0xd44   : > { %v1754_v49 = vmul.f32 %v2709_v4, %v1690_v25 }
 0xd45   : > { %v2711_v5 = vpop.eup %2710  ;;  %v1759_v44 = vpack.c.bf16 %v1756_v43, %v1756_v43 }
 0xd46   : > { %v1755_v46 = vmul.f32 %v2711_v5, %v1692_v31  ;;  %v1757_v50 = vpack.c.bf16 %v1754_v49, %v1754_v49 }
 0xd47   : > { %1777 = vrot.lane.b32.xlu0 %v1759_v44, %s2895_s13  ;;  %v1785_v36 = vrot.slane %v1759_v44, 4 }
 0xd48   : > { %v1758_v48 = vpack.c.bf16 %v1755_v46, %v1755_v46  ;;  %v1783_v14 = vrot.slane %v1757_v50, 4 }
 0xd4a   : > { %1775 = vrot.lane.b32.xlu1 %v1758_v48, %s2895_s13  ;;  %v1784_v62 = vrot.slane %v1758_v48, 4 }
 0xd4b   : > { %1773 = vrot.lane.b32.xlu0 %v1757_v50, %s2895_s13 }
 0xd4e   : > { %1763 = vrot.lane.b32.xlu1 %v1757_v50, %s2898_s16 }
 0xd4f   : > { %1765 = vrot.lane.b32.xlu0 %v1758_v48, %s2898_s16 }
 0xd52   : > { %1767 = vrot.lane.b32.xlu1 %v1759_v44, %s2898_s16 }
 0xd53   : > { %1799 = vperm.xlu0 %2662, %v3163_v15  }
 0xdb9   : > { %v1778_v51 = vpop.permute.xlu0 %1777 }
 0xdba   : > { %v1782_v52 = vsel %vm1294_vm3, %v1778_v51, 0 }
 0xdbb   : > { %v1811_v53 = vsel %vm1303_vm4, %v1782_v52, 0 }
 0xdbc   : > { %2477 = vmatpush3.bf16.msra.mxu1 %v1811_v53  ;;  %v1776_v55 = vpop.permute.xlu1 %1775 }
 0xdbd   : > { %v1780_v56 = vsel %vm1294_vm3, %v1776_v55, %v1778_v51  ;;  %v1774_v57 = vpop.permute.xlu0 %1773  ;;  %2478 = vmatprep.subr.bf16.mxu1 %v2894_v41 }
 0xdbe   : > { %v1779_v58 = vsel %vm1294_vm3, %v1774_v57, %v1776_v55  ;;  %2354 = vmatprep.subr.msk.bf16.mxu0 %vm1303_vm4, %v1780_v56 }
 0xdbf   : > { %v1806_v59 = vsel %vm1303_vm4, %v1779_v58, 0 }
 0xdc0   : > { %v1764_v60 = vpop.permute.xlu1 %1763  ;;  %1826 = vmatpush1.bf16.msra.mxu0 %v1806_v59 }
 0xdc1   : > { %v1772_v15 = vsel %vm1281_vm5, 0, %v1764_v60  ;;  %v1766_v61 = vpop.permute.xlu0 %1765 }
 0xdc2   : > { %v1769_v39 = vsel %vm1281_vm5, %v1764_v60, %v1766_v61  ;;  %v1787_v63 = vsel %vm1303_vm4, %v1772_v15, %v1783_v14 }
 0xdc3   : > { %v1791_v12 = vsel %vm1303_vm4, %v1769_v39, %v1784_v62 }
 0xdc4   : > { %v1768_v11 = vpop.permute.xlu1 %1767  ;;  %1827 = vmatprep.subr.bf16.mxu0 %v1791_v12 }
 0xdc5   : > { %v1770_v0 = vsel %vm1281_vm5, %v1766_v61, %v1768_v11  ;;  %1828 = vmatpush1.bf16.msra.mxu0 %v1787_v63 }
 0xdc6   : > { %v1795_v42 = vsel %vm1303_vm4, %v1770_v0, %v1785_v36 }
 0xdc7   : > { %2479 = vmatpush3.bf16.msra.mxu1 %v1795_v42 }
 0xdc8   : > { %2355 = vmatmul.mubr.msk.bf16.vlgmr.msra.gmra.mxu0 %vm1320_vm6, %v3133_v9  ;;  %2484 = vmatprep.subr.bf16.mxu1 %v2894_v41 }
 0xdc9   : > { %2010 = vmatprep.mubr.bf16.mxu0 %v2897_v54 }
 0xdca   : > { %2481 = vmatmul.mubr.msk.bf16.vlgmr.msra.gmra.mxu1 %vm1320_vm6, %v3133_v9 }
 0xdcb   : > { %2488 = vmatprep.mubr.msk.bf16.mxu1 %vm2896_vm2, %v2894_v41 }
 0xdce   : > { %v1800_v1 = vpop.permute.xlu0 %1799 }
 0xe88   : > { %v1847_v17 = vpop.f32.mrf.mxu0 }
 0xe89   : > { %v1848_v18 = vadd.f32 %v1847_v17, %v1800_v1 }
 0xe8a   : > { %v1849_v19 = vpop.f32.mrf.mxu0  ;;  %v1888_v21 = vpop.f32.mrf.mxu1 }
 0xe8b   : > { %v1894_v22 = vadd.f32 %v1848_v18, %v3437_v27  ;;  %v1850_v23 = vadd.f32 %v1849_v19, %v1800_v1  ;;  %v1889_v24 = vadd.f32 %v1888_v21, %v1800_v1 }
 0xe8c   : > { %v1851_v25 = vpop.f32.mrf.mxu0  ;;  %v2482_v20 = vpop.f32.mrf.mxu1 }
 0xe8d   : > { %v2357_v28 = vmul.f32 -1.442695, %v1894_v22  ;;  %v3497_v29 = vadd.f32 %v1850_v23, %v3441_v37  ;;  %v1896_v9 = vadd.f32 %v1889_v24, %v3444_v33 }
 0xe8e   : > { %v1852_v30 = vpop.f32.mrf.mxu0  ;;  %v1891_v31 = vpop.f32.mrf.mxu1 }
 0xe8f   : > { %2712 = vpow2.f32 %v2357_v28  ;;  %v2358_v32 = vmul.f32 -1.442695, %v3497_v29  ;;  %v2359_v8 = vmul.f32 -1.442695, %v1896_v9 }
 0xe90   : > { %v2483_v6 = vpop.f32.mrf.mxu1 }
 0xe91   : > { %2714 = vpow2.f32 %v2358_v32 }
 0xe92   : > { %2716 = vpow2.f32 %v2359_v8 }
 0xe9c   : > { %v2713_v27 = vpop.eup %2712 }
 0xe9d   : > { %v1906_v2 = vadd.f32 1.0, %v2713_v27 }
 0xe9e   : > { %v2715_v34 = vpop.eup %2714 }
 0xe9f   : > { %v2717_v35 = vpop.eup %2716  ;;  %v1907_v3 = vadd.f32 1.0, %v2715_v34  ;;  %2718 = vrcp.f32 %v1906_v2 }
 0xea0   : > { %v1908_v38 = vadd.f32 1.0, %v2717_v35 }
 0xea1   : > { %2720 = vrcp.f32 %v1907_v3 }
 0xea2   : > { %2722 = vrcp.f32 %v1908_v38 }
 0xeac   : > { %v2719_v37 = vpop.eup %2718 }
 0xead   : > { %v1915_v4 = vmul.f32 %v2719_v37, %v1894_v22 }
 0xeae   : > { %v2721_v33 = vpop.eup %2720 }
 0xeaf   : > { %v2723_v40 = vpop.eup %2722  ;;  %v1916_v45 = vmul.f32 %v2721_v33, %v3497_v29  ;;  %v1918_v5 = vpack.c.bf16 %v1915_v4, %v1915_v4 }
 0xeb0   : > { %v1917_v26 = vmul.f32 %v2723_v40, %v1896_v9 }
 0xeb1   : > { %v1919_v47 = vpack.c.bf16 %v1916_v45, %v1916_v45  ;;  %v1948_v61 = vrot.slane %v1918_v5, 4 }
 0xeb2   : > { %v1920_v43 = vpack.c.bf16 %v1917_v26, %v1917_v26 }
 0xeb3   : > { %1938 = vrot.lane.b32.xlu0 %v1919_v47, %s2901_s10  ;;  %v1949_v58 = vrot.slane %v1919_v47, 4 }
 0xeb4   : > { %1940 = vrot.lane.b32.xlu1 %v1920_v43, %s2901_s10  ;;  %v1950_v59 = vrot.slane %v1920_v43, 4 }
 0xeb7   : > { %1924 = vrot.lane.b32.xlu0 %v1918_v5, %s2902_s11 }
 0xeb8   : > { %1936 = vrot.lane.b32.xlu1 %v1918_v5, %s2901_s10 }
 0xebb   : > { %1928 = vrot.lane.b32.xlu0 %v1920_v43, %s2902_s11 }
 0xebc   : > { %1926 = vrot.lane.b32.xlu1 %v1919_v47, %s2902_s11 }
 0xec0   : > { %1964 = vperm.xlu1 %2663, %v3153_v13  }
 0xf25   : > { %v1939_v49 = vpop.permute.xlu0 %1938 }
 0xf26   : > { %v1941_v44 = vpop.permute.xlu1 %1940 }
 0xf27   : > { %v1947_v46 = vsel %vm1942_vm9, %v1941_v44, 0  ;;  %v1944_v48 = vsel %vm1942_vm9, %v1939_v49, %v1941_v44 }
 0xf28   : > { %v1976_v50 = vsel %vm1303_vm4, %v1947_v46, 0  ;;  %2360 = vmatprep.subr.msk.bf16.mxu0 %vm1303_vm4, %v1944_v48 }
 0xf29   : > { %2485 = vmatpush3.bf16.msra.mxu1 %v1976_v50  ;;  %v1925_v51 = vpop.permute.xlu0 %1924 }
 0xf2a   : > { %v1937_v52 = vpop.permute.xlu1 %1936  ;;  %2486 = vmatprep.subr.bf16.mxu1 %v2894_v41  ;;  %v1935_v56 = vsel %vm1930_vm10, 0, %v1925_v51 }
 0xf2b   : > { %v1943_v53 = vsel %vm1942_vm9, %v1937_v52, %v1939_v49  ;;  %v1952_v41 = vsel %vm1303_vm4, %v1935_v56, %v1948_v61 }
 0xf2c   : > { %v1971_v55 = vsel %vm1303_vm4, %v1943_v53, 0 }
 0xf2d   : > { %1991 = vmatpush1.bf16.msra.mxu0 %v1971_v55  ;;  %v1929_v13 = vpop.permute.xlu0 %1928 }
 0xf2e   : > { %v1927_v57 = vpop.permute.xlu1 %1926 }
 0xf2f   : > { %v1931_v60 = vsel %vm1930_vm10, %v1925_v51, %v1927_v57  ;;  %v1932_v15 = vsel %vm1930_vm10, %v1927_v57, %v1929_v13 }
 0xf30   : > { %v1956_v62 = vsel %vm1303_vm4, %v1931_v60, %v1949_v58  ;;  %v1960_v14 = vsel %vm1303_vm4, %v1932_v15, %v1950_v59 }
 0xf31   : > { %1992 = vmatprep.subr.bf16.mxu0 %v1956_v62  ;;  %2487 = vmatpush3.bf16.msra.mxu1 %v1960_v14 }
 0xf32   : > { %1993 = vmatpush1.bf16.msra.mxu0 %v1952_v41 }
 0xf34   : > { %2489 = vmatmul.mubr.msk.bf16.vlgmr.msra.gmra.mxu1 %vm1320_vm6, %v3123_v7 }
 0xf35   : > { %2361 = vmatmul.mubr.msk.bf16.vlgmr.msra.gmra.mxu0 %vm1320_vm6, %v3123_v7 }
 0xf36   : > { %2156 = vmatprep.mubr.bf16.mxu0 %v2897_v54 }
 0xf3b   : > { %v1965_v39 = vpop.permute.xlu1 %1964 }
 0xff4   : > { %v2053_v12 = vpop.f32.mrf.mxu1 }
 0xff5   : > { %v2054_v11 = vadd.f32 %v2053_v12, %v1965_v39  ;;  %v2012_v63 = vpop.f32.mrf.mxu0 }
 0xff6   : > { %v2013_v36 = vadd.f32 %v2012_v63, %v1965_v39  ;;  %v2490_v0 = vpop.f32.mrf.mxu1 }
 0xff7   : > { %v2365_v42 = vmul.f32 -1.442695, %v2054_v11  ;;  %v2014_v1 = vpop.f32.mrf.mxu0 }
 0xff8   : > { %v2363_v17 = vmul.f32 -1.442695, %v2013_v36  ;;  %v2015_v18 = vadd.f32 %v2014_v1, %v1965_v39  ;;  %v2056_v19 = vpop.f32.mrf.mxu1 }
 0xff9   : > { %2724 = vpow2.f32 %v2365_v42  ;;  %v2016_v21 = vpop.f32.mrf.mxu0 }
 0xffa   : > { %2726 = vpow2.f32 %v2363_v17  ;;  %v2364_v22 = vmul.f32 -1.442695, %v2015_v18  ;;  %v2491_v23 = vpop.f32.mrf.mxu1 }
 0xffb   : > { %v2017_v24 = vpop.f32.mrf.mxu0 }
 0xffc   : > { %2728 = vpow2.f32 %v2364_v22 }
0x1006   : > { %v2725_v7 = vpop.eup %2724 }
0x1007   : > { %v2727_v54 = vpop.eup %2726  ;;  %v2070_v25 = vadd.f32 1.0, %v2725_v7 }
0x1008   : > { %v2068_v20 = vadd.f32 1.0, %v2727_v54 }
0x1009   : > { %v2729_v28 = vpop.eup %2728  ;;  %2730 = vrcp.f32 %v2070_v25 }
0x100a   : > { %2732 = vrcp.f32 %v2068_v20  ;;  %v2069_v9 = vadd.f32 1.0, %v2729_v28 }
0x100c   : > { %2734 = vrcp.f32 %v2069_v9 }
0x1016   : > { %v2731_v30 = vpop.eup %2730 }
0x1017   : > { %v2733_v31 = vpop.eup %2732  ;;  %v2079_v32 = vmul.f32 %v2731_v30, %v2054_v11 }
0x1018   : > { %v2077_v27 = vmul.f32 %v2733_v31, %v2013_v36 }
0x1019   : > { %v2735_v8 = vpop.eup %2734  ;;  %v2082_v6 = vpack.c.bf16 %v2079_v32, %v2079_v32 }
0x101a   : > { %v2078_v2 = vmul.f32 %v2735_v8, %v2015_v18  ;;  %v2080_v35 = vpack.c.bf16 %v2077_v27, %v2077_v27 }
0x101b   : > { %2097 = vrot.lane.b32.xlu0 %v2082_v6, %s2895_s13 }
0x101c   : > { %v2081_v34 = vpack.c.bf16 %v2078_v2, %v2078_v2  ;;  %v2101_v5 = vrot.slane %v2080_v35, 4 }
0x101e   : > { %2095 = vrot.lane.b32.xlu1 %v2081_v34, %s2895_s13  ;;  %v2102_v43 = vrot.slane %v2081_v34, 4 }
0x101f   : > { %2093 = vrot.lane.b32.xlu0 %v2080_v35, %s2895_s13 }
0x1022   : > { %2085 = vrot.lane.b32.xlu1 %v2080_v35, %s2898_s16 }
0x1023   : > { %2087 = vrot.lane.b32.xlu0 %v2081_v34, %s2898_s16 }
0x1026   : > { %2112 = vperm.xlu1 %2663, %v3168_v16  }
0x108d   : > { %v2098_v3 = vpop.permute.xlu0 %2097 }
0x1090   : > { %v2096_v38 = vpop.permute.xlu1 %2095 }
0x1091   : > { %v2100_v37 = vsel %vm1294_vm3, %v2096_v38, %v2098_v3  ;;  %v2094_v33 = vpop.permute.xlu0 %2093 }
0x1092   : > { %v2099_v40 = vsel %vm1294_vm3, %v2094_v33, %v2096_v38  ;;  %2366 = vmatprep.subr.msk.bf16.mxu0 %vm1303_vm4, %v2100_v37 }
0x1093   : > { %v2119_v45 = vsel %vm1303_vm4, %v2099_v40, 0 }
0x1094   : > { %v2086_v26 = vpop.permute.xlu1 %2085  ;;  %2137 = vmatpush1.bf16.msra.mxu0 %v2119_v45 }
0x1095   : > { %v2091_v47 = vsel %vm1281_vm5, 0, %v2086_v26  ;;  %v2088_v4 = vpop.permute.xlu0 %2087 }
0x1096   : > { %v2089_v16 = vsel %vm1281_vm5, %v2086_v26, %v2088_v4  ;;  %v2104_v44 = vsel %vm1303_vm4, %v2091_v47, %v2101_v5 }
0x1097   : > { %v2108_v49 = vsel %vm1303_vm4, %v2089_v16, %v2102_v43 }
0x1098   : > { %2138 = vmatprep.subr.bf16.mxu0 %v2108_v49 }
0x1099   : > { %2139 = vmatpush1.bf16.msra.mxu0 %v2104_v44 }
0x109c   : > { %2367 = vmatmul.mubr.msk.bf16.vlgmr.msra.gmra.mxu0 %vm1320_vm6, %v3138_v10 }
0x10a1   : > { %v2113_v48 = vpop.permute.xlu1 %2112 }
0x115c   : > { %v2158_v46 = vpop.f32.mrf.mxu0 }
0x115e   : > { %v2159_v50 = vpop.f32.mrf.mxu0 }
0x115f   : > { %v2160_v51 = vadd.f32 %v2159_v50, %v2113_v48 }
0x1160   : > { %v2161_v52 = vpop.f32.mrf.mxu0 }
0x1161   : > { %v2164_v53 = vadd.f32 %v2160_v51, %v3497_v29 }
0x1162   : > { %v2162_v55 = vpop.f32.mrf.mxu0 }
0x1163   : > { %2165 = vst [vmem:[%s3091_s20] sm:$0xff] %v2164_v53 }
0x1164 PF: > { %s2492_s12 = smul.u32 5, %s2870_s22  ;;  %s2182_s18 = sshll.u32 %s3091_s20, 4  ;;  %s2183_s18 = int_to_ptr.vmem [resolvable:$true] %s2182_s18 }
0x1165   : > { %s3626_s28 = sld [smem:[#allocation24_spill]]  ;;  %s3627_s7 = sand.u32 1, %s2858_s19  }
0x1166   : > { %s2178_s5 = sadd.s32 %s2866_s21, %s2492_s12  ;;  %s2167_s14 = scalar_lea.sflag [#allocation5], %s3627_s7 }
0x1167   : > { %s2369_s29 = sshll.u32 %s2178_s5, 7  ;;  %s2788_s9 = scalar_lea.vmem %s2183_s18, 128 }
0x1168   : > { %p2789_p8 = scmp.ne.s32.totalorder %s2183_s18, %s2788_s9  ;;  %s2903_s17 = smov [#allocation4]  }
0x1169   : > { %s2792_s26 = sshll.u32 %s2903_s17, 4  ;;  %s2793_s26 = int_to_ptr.vmem [resolvable:$false] %s2792_s26 }
0x116a   : > { %p2790_p12 = pnand %p2789_p8, %p2985_p3  ;;  %s2794_s23 = scalar_lea.vmem %s2793_s26, 256 }
0x116b   : > { %s2180_s6 = scalar_lea.hbm %s3626_s28, %s2369_s29  ;;  %p2795_p11 = scmp.lt.s32.totalorder %s2183_s18, %s2793_s26 }
0x116c   : > { %p2791_p13 = pneg %p2790_p12  ;;  %p2796_p0 = scmp.lt.s32.totalorder %s2794_s23, %s2788_s9 }
0x116e   : > { %p2797_p1 = por %p2796_p0, %p2795_p11 }
0x1170   : > { %p2798_p4 = pnand %p2797_p1, %p2791_p13 }
0x1172   : > { %2801 = shalt.err (!%p2798_p4)
}
0x1173   : > { %s2802_s21 = scalar_lea.hbm %s2180_s6, 128  ;;  %s2806_s24 = scalar_lea.hbm %s3626_s28, 1280 }
0x1174   : > { %p2803_p2 = scmp.ne.s32.totalorder %s2180_s6, %s2802_s21  ;;  %p2807_p7 = scmp.lt.s32.totalorder %s2180_s6, %s3626_s28 }
0x1175   : > { %p2808_p9 = scmp.lt.s32.totalorder %s2806_s24, %s2802_s21 }
0x1176   : > { %p2804_p5 = pnand %p2803_p2, %p2985_p3 }
0x1177   : > { %p2809_p10 = por %p2808_p9, %p2807_p7 }
0x1178   : > { %p2805_p6 = pneg %p2804_p5 }
0x117a   : > { %p2810_p8 = pnand %p2809_p10, %p2805_p6 }
0x117c   : > { %2813 = shalt.err (!%p2810_p8)
}
0x117d   : > { %2497 = dma.vmem_to_hbm [thread:$0]  (%p2985_p3), %s2183_s18, 128, %s2180_s6, %s2167_s14  }
0x117e PF: > { %s3628_s15 = sld [smem:[#allocation18_spill]] }
0x117f   : > { %s3629_s30 = sld [smem:[#allocation14_spill]] }
0x1180   : > { %s3630_s10 = sld [smem:[#allocation22_spill]] }
0x1184   : > { %p2505_p12 = scmp.ge.s32.totalorder %s3628_s15, 2 }
0x1185   : > { %s2194_s11 = sand.u32 1, %s3629_s30  }
0x1186   : > { %p3631_p13 = scmp.ne.s32.totalorder %s3630_s10, 0  ;;  %s2195_s12 = scalar_lea.sflag [#allocation5], %s2194_s11 }
0x1188   : > { %p2500_p11 = pnand %p2505_p12, %p3631_p13 }
0x118a   : > { %p2501_p0 = pneg %p2500_p11 }
0x118c   : > { %2849 = dma.done.wait (%p2501_p0), %s2195_s12, 128  }
0x118d   : > { %2851 = vsyncadd (%p2501_p0), %s2195_s12, 4294967168  ;;  %s18_s25 = sadd.s32 1, %s3628_s15   ;;  %s3632_s5 = sld [smem:[#allocation15_spill]] }
0x118e   : > { %p15_p1 = scmp.ge.s32.totalorder %s18_s25, 12   ;;  %s3633_s20 = sld [smem:[#allocation23_spill]] }
0x118f   : > { %s3634_s21 = sld [smem:[#allocation16_spill]]  ;;  %s3638_s18 = smov %s2858_s19 }
0x1190   : > { %s3635_s22 = sld [smem:[#allocation17_spill]]  ;;  %17 = sbr.rel (!%p15_p1) target bundleno = 7 (0x7), region = 109 }
0x1191   : > { %s3636_s23 = sld [smem:[#allocation19_spill]] }
0x1192   : > { %s3637_s24 = sld [smem:[#allocation21_spill]] }
0x1193   : > { %s3639_s19 = smov %s3632_s5 }
0x1195   :  { %2200 = vsyncpa [#allocation5], 1 }
0x1196   :  { %2202 = vsyncpa [#allocation5 + $0x1], 1 }
0x1197   :  { %2203 = vsyncmov [#allocation3] }
0x119a   :  { %s2204_s27 = vpop.sfrf %2203 }
0x119b   :  { %p2372_p3 = scmp.ne.s32.totalorder %s2204_s27, 0 }
0x119d   :  { %2208 = shalt.err (%p2372_p3)  }
0x119e   :  { %2210 = vsyncmov [#allocation3 + $0x1] }
0x11a1   :  { %s2211_s29 = vpop.sfrf %2210 }
0x11a2   :  { %p2373_p4 = scmp.ne.s32.totalorder %s2211_s29, 0 }
0x11a4   :  { %2215 = shalt.err (%p2373_p4)  }

</bundles_post_ra>
